<compile_context>
chip_gen: v6e
topology: v6e:2x2x1
jax: 0.10.0
libtpu: 0.0.40
codegen_flags: <defaults>
</compile_context>

<pallas_src>
import functools

import jax
import jax.numpy as jnp
from jax import lax
from jax.experimental import pallas as pl
from jax.experimental.pallas import tpu as pltpu

EPS = 1e-5
_BF16 = jnp.bfloat16
_F32 = jnp.float32


def _round_up(v, m):
    return ((v + m - 1) // m) * m


def _pick_spatial_tile(hw):
    """Largest lane-dense tile that still yields >=2 spatial grid steps."""
    for t in (512, 384, 256, 128):
        if hw % t == 0 and hw // t >= 2:
            return t
    return hw


def _packed_stats(parts):
    """Pack per-channel (C,1) scalars into one (C, len(parts)) array via
    selects so the stats land in a single store (avoids 4 masked vst and any
    minor-dim concat lowering edge cases)."""
    n = len(parts)
    col = lax.broadcasted_iota(jnp.int32, (parts[0].shape[0], n), 1)
    out = parts[-1]
    for i in range(n - 2, -1, -1):
        out = jnp.where(col == i, parts[i], out)
    return out


def _im2col_3x3(x, xpad_ref, patch_ref, H, W, PAD):
    """Builds the 9-tap im2col matrix for a 3x3 SAME conv.

    x        : (C, H*W) activation (channels on sublanes, flat spatial on lanes)
    xpad_ref : (C, PAD + H*W + PAD) f32 VMEM scratch (flat halo, PAD >= W+1)
    patch_ref: (9*C, H*W) bf16 VMEM scratch, tap-major / channel-minor rows

    The zero slabs cover all vertically out-of-range taps, so only dx != 0
    taps need a column mask.
    """
    HW = H * W
    C = x.shape[0]
    pdt = patch_ref.dtype
    zeros_slab = jnp.zeros((C, PAD), xpad_ref.dtype)
    xpad_ref[:, :PAD] = zeros_slab                 # left halo slab
    xpad_ref[:, PAD + HW:] = zeros_slab            # right halo slab
    xpad_ref[:, PAD:PAD + HW] = x.astype(xpad_ref.dtype)

    xx = lax.broadcasted_iota(jnp.int32, (1, HW), 1) % W

    t = 0
    for dy in (-1, 0, 1):
        for dx in (-1, 0, 1):
            d = dy * W + dx
            tap = xpad_ref[:, PAD + d:PAD + d + HW]            # (C, HW) f32
            if dx != 0:
                valid = (xx + dx >= 0) & (xx + dx < W)
                tap = jnp.where(valid, tap, jnp.zeros_like(tap))
            patch_ref[t * C:(t + 1) * C, :] = tap.astype(pdt)  # aligned store
            t += 1


def _pass1_kernel(x_ref, w1_ref, ws_ref, c1_ref, st_ref,
                  xpad_ref, patch_ref, *, H, W, PAD):
    x = x_ref[0]                                               # (Cp, HW) bf16
    _im2col_3x3(x, xpad_ref, patch_ref, H, W, PAD)
    c1 = jnp.dot(w1_ref[...], patch_ref[...],
                 preferred_element_type=_F32)                  # (Cq, HW) f32
    # skip 1x1 conv is computed here ONLY for its BN statistics; it is
    # recomputed (bit-identically) in pass 3 instead of round-tripping via HBM.
    sk = jnp.dot(ws_ref[...], x, preferred_element_type=_F32)  # (Cq, HW) f32
    c1_ref[0] = c1.astype(c1_ref.dtype)
    st_ref[0] = _packed_stats([jnp.sum(c1, axis=1, keepdims=True),
                               jnp.sum(c1 * c1, axis=1, keepdims=True),
                               jnp.sum(sk, axis=1, keepdims=True),
                               jnp.sum(sk * sk, axis=1, keepdims=True)])


def _pass2_kernel(c1_ref, w2_ref, sc1_ref, sh1_ref, c2_ref, st_ref,
                  xpad_ref, patch_ref, *, H, W, PAD):
    relu1 = jnp.maximum(
        c1_ref[0].astype(_F32) * sc1_ref[...] + sh1_ref[...], 0.0)
    _im2col_3x3(relu1, xpad_ref, patch_ref, H, W, PAD)
    c2 = jnp.dot(w2_ref[...], patch_ref[...],
                 preferred_element_type=_F32)                  # (Cq, HW) f32
    c2_ref[0] = c2.astype(c2_ref.dtype)
    st_ref[0] = _packed_stats([jnp.sum(c2, axis=1, keepdims=True),
                               jnp.sum(c2 * c2, axis=1, keepdims=True)])


def _pass3_kernel(c2_ref, x_ref, ws_ref, sc2_ref, sh2_ref, scs_ref, shs_ref,
                  o_ref):
    # recompute the 1x1 skip conv for this spatial tile (columns of a matmul
    # are independent, so this matches the pass-1 statistics exactly).
    sk = jnp.dot(ws_ref[...], x_ref[0], preferred_element_type=_F32)
    bn2 = c2_ref[0].astype(_F32) * sc2_ref[...] + sh2_ref[...]
    o_ref[0] = jnp.maximum(bn2 + sk * scs_ref[...] + shs_ref[...], 0.0)


def _bn_scale_shift(s, ss, m, gamma, beta):
    # Training-mode BatchNorm (batch stats, biased variance) folded into a
    # per-channel affine: y = x * scale + shift.
    mean = s / m
    var = jnp.maximum(ss / m - mean * mean, 0.0)
    inv = gamma * lax.rsqrt(var + EPS)
    return inv.reshape(-1, 1), (beta - mean * inv).reshape(-1, 1)


@jax.jit
def residual_forward(x_nchw, params):
    """x_nchw: (N, Cin, H, W) float32.  Returns (N, Cout, H, W) float32."""
    N, Cin, H, W = x_nchw.shape
    Cout = params["w1"].shape[-1]
    HW = H * W
    M = N * HW
    PAD = _round_up(W + 1, 128)       # lane-aligned flat halo (>= W+1)
    Cp = _round_up(Cin, 16)           # bf16 packed-sublane alignment
    Cq = _round_up(Cout, 16)

    # ---- tiny layout plumbing (fused under jit) -----------------------------
    x_flat = x_nchw.reshape(N, Cin, HW)
    x_flat = jnp.pad(x_flat, ((0, 0), (0, Cp - Cin), (0, 0))).astype(_BF16)

    # HWIO (ky,kx,ci,co) -> (co,ky,kx,ci) -> (co, 9*C): tap-major, ci-minor
    w1_t = jnp.transpose(params["w1"], (3, 0, 1, 2))
    w1_t = jnp.pad(w1_t, ((0, Cq - Cout), (0, 0), (0, 0), (0, Cp - Cin)))
    w1_t = w1_t.reshape(Cq, 9 * Cp).astype(_BF16)

    w2_t = jnp.transpose(params["w2"], (3, 0, 1, 2))
    w2_t = jnp.pad(w2_t, ((0, Cq - Cout), (0, 0), (0, 0), (0, Cq - Cout)))
    w2_t = w2_t.reshape(Cq, 9 * Cq).astype(_BF16)

    ws_t = jnp.pad(params["ws"].T,
                   ((0, Cq - Cout), (0, Cp - Cin))).astype(_BF16)

    def padc(v):  # zero-pad gamma/beta so padded channels stay exactly zero
        return jnp.pad(v, (0, Cq - Cout))

    g1, b1 = padc(params["g1"]), padc(params["b1"])
    g2, b2 = padc(params["g2"]), padc(params["b2"])
    gs, bs = padc(params["gs"]), padc(params["bs"])

    def tile_spec(c, last):
        return pl.BlockSpec((1, c, last), lambda n: (n, 0, 0))

    def full2d(shape):
        return pl.BlockSpec(shape, lambda n: (0, 0))

    cp1 = pltpu.CompilerParams(dimension_semantics=("parallel",))

    # ---- pass 1: conv1 (3x3) + BN stats for conv1 and the 1x1 skip ----------
    c1, st1 = pl.pallas_call(
        functools.partial(_pass1_kernel, H=H, W=W, PAD=PAD),
        grid=(N,),
        in_specs=[tile_spec(Cp, HW),
                  full2d((Cq, 9 * Cp)),
                  full2d((Cq, Cp))],
        out_specs=(tile_spec(Cq, HW), tile_spec(Cq, 4)),
        out_shape=(jax.ShapeDtypeStruct((N, Cq, HW), _BF16),
                   jax.ShapeDtypeStruct((N, Cq, 4), _F32)),
        scratch_shapes=[pltpu.VMEM((Cp, HW + 2 * PAD), _F32),
                        pltpu.VMEM((9 * Cp, HW), _BF16)],
        compiler_params=cp1,
    )(x_flat, w1_t, ws_t)

    st1 = jnp.sum(st1, axis=0)                                  # (Cq, 4)
    sc1, sh1 = _bn_scale_shift(st1[:, 0], st1[:, 1], M, g1, b1)
    scs, shs = _bn_scale_shift(st1[:, 2], st1[:, 3], M, gs, bs)

    # ---- pass 2: bn1 + relu -> conv2 (3x3) + per-tile BN sums ---------------
    c2, st2 = pl.pallas_call(
        functools.partial(_pass2_kernel, H=H, W=W, PAD=PAD),
        grid=(N,),
        in_specs=[tile_spec(Cq, HW),
                  full2d((Cq, 9 * Cq)),
                  full2d((Cq, 1)),
                  full2d((Cq, 1))],
        out_specs=(tile_spec(Cq, HW), tile_spec(Cq, 2)),
        out_shape=(jax.ShapeDtypeStruct((N, Cq, HW), _BF16),
                   jax.ShapeDtypeStruct((N, Cq, 2), _F32)),
        scratch_shapes=[pltpu.VMEM((Cq, HW + 2 * PAD), _F32),
                        pltpu.VMEM((9 * Cq, HW), _BF16)],
        compiler_params=cp1,
    )(c1, w2_t, sc1, sh1)

    st2 = jnp.sum(st2, axis=0)                                  # (Cq, 2)
    sc2, sh2 = _bn_scale_shift(st2[:, 0], st2[:, 1], M, g2, b2)

    # ---- pass 3: recompute skip 1x1, bn2 + bn_skip + add + final relu -------
    T = _pick_spatial_tile(HW)   # spatial tiling -> several grid steps / core

    def sp_spec(c):
        return pl.BlockSpec((1, c, T), lambda n, s: (n, 0, s))

    def sp_full(shape):
        return pl.BlockSpec(shape, lambda n, s: (0, 0))

    out = pl.pallas_call(
        _pass3_kernel,
        grid=(N, HW // T),
        in_specs=[sp_spec(Cq), sp_spec(Cp), sp_full((Cq, Cp)),
                  sp_full((Cq, 1)), sp_full((Cq, 1)),
                  sp_full((Cq, 1)), sp_full((Cq, 1))],
        out_specs=sp_spec(Cq),
        out_shape=jax.ShapeDtypeStruct((N, Cq, HW), _F32),
        compiler_params=pltpu.CompilerParams(
            dimension_semantics=("parallel", "parallel")),
    )(c2, x_flat, ws_t, sc2, sh2, scs, shs)

    return out[:, :Cout, :].reshape(N, Cout, H, W)


# ----------------------------- pure-JAX reference -----------------------------
def _bn_ref(x, gamma, beta):
    mean = jnp.mean(x, axis=(0, 2, 3), keepdims=True)
    var = jnp.mean(jnp.square(x - mean), axis=(0, 2, 3), keepdims=True)
    g = gamma.reshape(1, -1, 1, 1)
    b = beta.reshape(1, -1, 1, 1)
    return (x - mean) * lax.rsqrt(var + EPS) * g + b


def residual_reference(x_nchw, params):
    dn = ("NCHW", "HWIO", "NCHW")
    hi = lax.Precision.HIGHEST
    c1 = lax.conv_general_dilated(x_nchw, params["w1"], (1, 1), "SAME",
                                  dimension_numbers=dn, precision=hi)
    r1 = jnp.maximum(_bn_ref(c1, params["g1"], params["b1"]), 0.0)
    c2 = lax.conv_general_dilated(r1, params["w2"], (1, 1), "SAME",
                                  dimension_numbers=dn, precision=hi)
    b2 = _bn_ref(c2, params["g2"], params["b2"])
    Cin, Cout = params["ws"].shape
    cs = lax.conv_general_dilated(x_nchw, params["ws"].reshape(1, 1, Cin, Cout),
                                  (1, 1), "SAME", dimension_numbers=dn,
                                  precision=hi)
    skp = _bn_ref(cs, params["gs"], params["bs"])
    return jnp.maximum(b2 + skp, 0.0)


if __name__ == "__main__":
    key = jax.random.PRNGKey(0)
    N, Cin, H, W = 2, 4, 16, 16
    Cout = 8  # out_dim != inp_dim -> skip branch has a 1x1 conv + BN

    keys = jax.random.split(key, 10)
    params = {
        "w1": 0.1 * jax.random.normal(keys[0], (3, 3, Cin, Cout), jnp.float32),
        "g1": 1.0 + 0.1 * jax.random.normal(keys[1], (Cout,), jnp.float32),
        "b1": 0.1 * jax.random.normal(keys[2], (Cout,), jnp.float32),
        "w2": 0.1 * jax.random.normal(keys[3], (3, 3, Cout, Cout), jnp.float32),
        "g2": 1.0 + 0.1 * jax.random.normal(keys[4], (Cout,), jnp.float32),
        "b2": 0.1 * jax.random.normal(keys[5], (Cout,), jnp.float32),
        "ws": 0.1 * jax.random.normal(keys[6], (Cin, Cout), jnp.float32),
        "gs": 1.0 + 0.1 * jax.random.normal(keys[7], (Cout,), jnp.float32),
        "bs": 0.1 * jax.random.normal(keys[8], (Cout,), jnp.float32),
    }

    # input in the PyTorch NCHW convention (used directly, no transpose needed)
    x_nchw = jax.random.normal(keys[9], (N, Cin, H, W), jnp.float32)

    out = residual_forward(x_nchw, params)
    out = jax.block_until_ready(out)

    ref = residual_reference(x_nchw, params)
    max_err = float(jnp.max(jnp.abs(out - ref)))
    mean_err = float(jnp.mean(jnp.abs(out - ref)))
    # bf16 MXU operands + bf16 intermediates: per-element rounding noise is
    # ~1e-2 on BN-normalized O(1) outputs; structural bugs show up as O(1)
    # max error and >>1e-2 mean error.
    if max_err > 1e-1 or mean_err > 1e-2:
        raise AssertionError(
            f"mismatch vs reference: max abs err = {max_err}, "
            f"mean abs err = {mean_err}")

    print("KERNEL_OK")
</pallas_src>

<mosaic_0001>
module attributes {stable_mosaic.version = 11 : i64} {
  func.func @_pass1_kernel(%arg0: i32, %arg1: memref<1x16x256xbf16, #tpu.memory_space<vmem>>, %arg2: memref<16x144xbf16, #tpu.memory_space<vmem>>, %arg3: memref<16x16xbf16, #tpu.memory_space<vmem>>, %arg4: memref<1x16x256xbf16, #tpu.memory_space<vmem>>, %arg5: memref<1x16x4xf32, #tpu.memory_space<vmem>>, %arg6: memref<16x512xf32, #tpu.memory_space<vmem>>, %arg7: memref<144x256xbf16, #tpu.memory_space<vmem>>) attributes {dimension_semantics = [#tpu.dimension_semantics<parallel>], iteration_bounds = array<i64: 2>, scalar_prefetch = 0 : i64, scratch_operands = 2 : i64, tpu.core_type = #tpu.core_type<tc>, window_params = [{transform_indices = @transform_0, window_bounds = array<i64: 1, 16, 256>}, {pipeline_mode = #tpu.pipeline_mode<synchronous>, transform_indices = @transform_1, window_bounds = array<i64: 16, 144>}, {pipeline_mode = #tpu.pipeline_mode<synchronous>, transform_indices = @transform_2, window_bounds = array<i64: 16, 16>}, {transform_indices = @transform_3, window_bounds = array<i64: 1, 16, 256>}, {transform_indices = @transform_4, window_bounds = array<i64: 1, 16, 4>}]} {
    %c0 = arith.constant 0 : index
    %c0_0 = arith.constant 0 : index
    %c0_1 = arith.constant 0 : index
    %0 = vector.load %arg1[%c0, %c0_0, %c0_1] : memref<1x16x256xbf16, #tpu.memory_space<vmem>>, vector<1x16x256xbf16>
    %1 = vector.shape_cast %0 : vector<1x16x256xbf16> to vector<16x256xbf16>
    %cst = arith.constant 0.000000e+00 : f32
    %2 = vector.broadcast %cst : f32 to vector<16x128xf32>
    %c0_2 = arith.constant 0 : index
    %c0_3 = arith.constant 0 : index
    %3 = vector.load %arg6[%c0_2, %c0_3] : memref<16x512xf32, #tpu.memory_space<vmem>>, vector<16x128xf32>
    tpu.vector_store %arg6[%c0_2, %c0_3], %2 {strides = array<i32>} : memref<16x512xf32, #tpu.memory_space<vmem>>, vector<16x128xf32>,
    %c0_4 = arith.constant 0 : index
    %c384 = arith.constant 384 : index
    %4 = vector.load %arg6[%c0_4, %c384] : memref<16x512xf32, #tpu.memory_space<vmem>>, vector<16x128xf32>
    tpu.vector_store %arg6[%c0_4, %c384], %2 {strides = array<i32>} : memref<16x512xf32, #tpu.memory_space<vmem>>, vector<16x128xf32>,
    %5 = arith.extf %1 : vector<16x256xbf16> to vector<16x256xf32>
    %c0_5 = arith.constant 0 : index
    %c128 = arith.constant 128 : index
    %6 = vector.load %arg6[%c0_5, %c128] : memref<16x512xf32, #tpu.memory_space<vmem>>, vector<16x256xf32>
    tpu.vector_store %arg6[%c0_5, %c128], %5 {strides = array<i32>} : memref<16x512xf32, #tpu.memory_space<vmem>>, vector<16x256xf32>,
    %7 = tpu.iota {dimensions = array<i32: 1>} : vector<1x256xi32>
    %c16_i32 = arith.constant 16 : i32
    %c0_i32 = arith.constant 0 : i32
    %8 = arith.cmpi eq, %c16_i32, %c0_i32 : i32
    %c1_i32 = arith.constant 1 : i32
    %9 = arith.select %8, %c1_i32, %c16_i32 : i32
    %10 = vector.broadcast %9 : i32 to vector<1x256xi32>
    %11 = arith.remsi %7, %10 : vector<1x256xi32>
    %c0_i32_6 = arith.constant 0 : i32
    %12 = vector.broadcast %c0_i32_6 : i32 to vector<1x256xi32>
    %13 = arith.cmpi ne, %11, %12 : vector<1x256xi32>
    %c0_i32_7 = arith.constant 0 : i32
    %14 = vector.broadcast %c0_i32_7 : i32 to vector<1x256xi32>
    %15 = arith.cmpi slt, %11, %14 : vector<1x256xi32>
    %c0_i32_8 = arith.constant 0 : i32
    %16 = arith.cmpi slt, %9, %c0_i32_8 : i32
    %17 = vector.broadcast %16 : i1 to vector<1x256xi1>
    %18 = vector.broadcast %17 : vector<1x256xi1> to vector<1x256xi1>
    %19 = arith.xori %15, %18 : vector<1x256xi1>
    %20 = arith.andi %19, %13 : vector<1x256xi1>
    %21 = vector.broadcast %9 : i32 to vector<1x256xi32>
    %22 = arith.addi %11, %21 : vector<1x256xi32>
    %23 = arith.select %20, %22, %11 : vector<1x256xi1>, vector<1x256xi32>
    %c0_9 = arith.constant 0 : index
    %c111 = arith.constant 111 : index
    %24 = vector.load %arg6[%c0_9, %c111] : memref<16x512xf32, #tpu.memory_space<vmem>>, vector<16x256xf32>
    %c-1_i32 = arith.constant -1 : i32
    %25 = vector.broadcast %c-1_i32 : i32 to vector<1x256xi32>
    %26 = arith.addi %23, %25 : vector<1x256xi32>
    %c0_i32_10 = arith.constant 0 : i32
    %27 = vector.broadcast %c0_i32_10 : i32 to vector<1x256xi32>
    %28 = arith.cmpi sge, %26, %27 : vector<1x256xi32>
    %c-1_i32_11 = arith.constant -1 : i32
    %29 = vector.broadcast %c-1_i32_11 : i32 to vector<1x256xi32>
    %30 = arith.addi %23, %29 : vector<1x256xi32>
    %c16_i32_12 = arith.constant 16 : i32
    %31 = vector.broadcast %c16_i32_12 : i32 to vector<1x256xi32>
    %32 = arith.cmpi slt, %30, %31 : vector<1x256xi32>
    %33 = arith.andi %28, %32 : vector<1x256xi1>
    %cst_13 = arith.constant 0.000000e+00 : f32
    %34 = vector.broadcast %cst_13 : f32 to vector<16x256xf32>
    %35 = vector.shape_cast %33 : vector<1x256xi1> to vector<1x256xi1>
    %36 = vector.broadcast %35 : vector<1x256xi1> to vector<16x256xi1>
    %37 = arith.select %36, %24, %34 : vector<16x256xi1>, vector<16x256xf32>
    %38 = arith.truncf %37 : vector<16x256xf32> to vector<16x256xbf16>
    %c0_14 = arith.constant 0 : index
    %c0_15 = arith.constant 0 : index
    %39 = vector.load %arg7[%c0_14, %c0_15] : memref<144x256xbf16, #tpu.memory_space<vmem>>, vector<16x256xbf16>
    tpu.vector_store %arg7[%c0_14, %c0_15], %38 {strides = array<i32>} : memref<144x256xbf16, #tpu.memory_space<vmem>>, vector<16x256xbf16>,
    %c0_16 = arith.constant 0 : index
    %c112 = arith.constant 112 : index
    %40 = vector.load %arg6[%c0_16, %c112] : memref<16x512xf32, #tpu.memory_space<vmem>>, vector<16x256xf32>
    %41 = arith.truncf %40 : vector<16x256xf32> to vector<16x256xbf16>
    %c16 = arith.constant 16 : index
    %c0_17 = arith.constant 0 : index
    %42 = vector.load %arg7[%c16, %c0_17] : memref<144x256xbf16, #tpu.memory_space<vmem>>, vector<16x256xbf16>
    tpu.vector_store %arg7[%c16, %c0_17], %41 {strides = array<i32>} : memref<144x256xbf16, #tpu.memory_space<vmem>>, vector<16x256xbf16>,
    %c0_18 = arith.constant 0 : index
    %c113 = arith.constant 113 : index
    %43 = vector.load %arg6[%c0_18, %c113] : memref<16x512xf32, #tpu.memory_space<vmem>>, vector<16x256xf32>
    %c1_i32_19 = arith.constant 1 : i32
    %44 = vector.broadcast %c1_i32_19 : i32 to vector<1x256xi32>
    %45 = arith.addi %23, %44 : vector<1x256xi32>
    %c0_i32_20 = arith.constant 0 : i32
    %46 = vector.broadcast %c0_i32_20 : i32 to vector<1x256xi32>
    %47 = arith.cmpi sge, %45, %46 : vector<1x256xi32>
    %c1_i32_21 = arith.constant 1 : i32
    %48 = vector.broadcast %c1_i32_21 : i32 to vector<1x256xi32>
    %49 = arith.addi %23, %48 : vector<1x256xi32>
    %c16_i32_22 = arith.constant 16 : i32
    %50 = vector.broadcast %c16_i32_22 : i32 to vector<1x256xi32>
    %51 = arith.cmpi slt, %49, %50 : vector<1x256xi32>
    %52 = arith.andi %47, %51 : vector<1x256xi1>
    %cst_23 = arith.constant 0.000000e+00 : f32
    %53 = vector.broadcast %cst_23 : f32 to vector<16x256xf32>
    %54 = vector.shape_cast %52 : vector<1x256xi1> to vector<1x256xi1>
    %55 = vector.broadcast %54 : vector<1x256xi1> to vector<16x256xi1>
    %56 = arith.select %55, %43, %53 : vector<16x256xi1>, vector<16x256xf32>
    %57 = arith.truncf %56 : vector<16x256xf32> to vector<16x256xbf16>
    %c32 = arith.constant 32 : index
    %c0_24 = arith.constant 0 : index
    %58 = vector.load %arg7[%c32, %c0_24] : memref<144x256xbf16, #tpu.memory_space<vmem>>, vector<16x256xbf16>
    tpu.vector_store %arg7[%c32, %c0_24], %57 {strides = array<i32>} : memref<144x256xbf16, #tpu.memory_space<vmem>>, vector<16x256xbf16>,
    %c0_25 = arith.constant 0 : index
    %c127 = arith.constant 127 : index
    %59 = vector.load %arg6[%c0_25, %c127] : memref<16x512xf32, #tpu.memory_space<vmem>>, vector<16x256xf32>
    %c-1_i32_26 = arith.constant -1 : i32
    %60 = vector.broadcast %c-1_i32_26 : i32 to vector<1x256xi32>
    %61 = arith.addi %23, %60 : vector<1x256xi32>
    %c0_i32_27 = arith.constant 0 : i32
    %62 = vector.broadcast %c0_i32_27 : i32 to vector<1x256xi32>
    %63 = arith.cmpi sge, %61, %62 : vector<1x256xi32>
    %c-1_i32_28 = arith.constant -1 : i32
    %64 = vector.broadcast %c-1_i32_28 : i32 to vector<1x256xi32>
    %65 = arith.addi %23, %64 : vector<1x256xi32>
    %c16_i32_29 = arith.constant 16 : i32
    %66 = vector.broadcast %c16_i32_29 : i32 to vector<1x256xi32>
    %67 = arith.cmpi slt, %65, %66 : vector<1x256xi32>
    %68 = arith.andi %63, %67 : vector<1x256xi1>
    %cst_30 = arith.constant 0.000000e+00 : f32
    %69 = vector.broadcast %cst_30 : f32 to vector<16x256xf32>
    %70 = vector.shape_cast %68 : vector<1x256xi1> to vector<1x256xi1>
    %71 = vector.broadcast %70 : vector<1x256xi1> to vector<16x256xi1>
    %72 = arith.select %71, %59, %69 : vector<16x256xi1>, vector<16x256xf32>
    %73 = arith.truncf %72 : vector<16x256xf32> to vector<16x256xbf16>
    %c48 = arith.constant 48 : index
    %c0_31 = arith.constant 0 : index
    %74 = vector.load %arg7[%c48, %c0_31] : memref<144x256xbf16, #tpu.memory_space<vmem>>, vector<16x256xbf16>
    tpu.vector_store %arg7[%c48, %c0_31], %73 {strides = array<i32>} : memref<144x256xbf16, #tpu.memory_space<vmem>>, vector<16x256xbf16>,
    %c0_32 = arith.constant 0 : index
    %c128_33 = arith.constant 128 : index
    %75 = vector.load %arg6[%c0_32, %c128_33] : memref<16x512xf32, #tpu.memory_space<vmem>>, vector<16x256xf32>
    %76 = arith.truncf %75 : vector<16x256xf32> to vector<16x256xbf16>
    %c64 = arith.constant 64 : index
    %c0_34 = arith.constant 0 : index
    %77 = vector.load %arg7[%c64, %c0_34] : memref<144x256xbf16, #tpu.memory_space<vmem>>, vector<16x256xbf16>
    tpu.vector_store %arg7[%c64, %c0_34], %76 {strides = array<i32>} : memref<144x256xbf16, #tpu.memory_space<vmem>>, vector<16x256xbf16>,
    %c0_35 = arith.constant 0 : index
    %c129 = arith.constant 129 : index
    %78 = vector.load %arg6[%c0_35, %c129] : memref<16x512xf32, #tpu.memory_space<vmem>>, vector<16x256xf32>
    %c1_i32_36 = arith.constant 1 : i32
    %79 = vector.broadcast %c1_i32_36 : i32 to vector<1x256xi32>
    %80 = arith.addi %23, %79 : vector<1x256xi32>
    %c0_i32_37 = arith.constant 0 : i32
    %81 = vector.broadcast %c0_i32_37 : i32 to vector<1x256xi32>
    %82 = arith.cmpi sge, %80, %81 : vector<1x256xi32>
    %c1_i32_38 = arith.constant 1 : i32
    %83 = vector.broadcast %c1_i32_38 : i32 to vector<1x256xi32>
    %84 = arith.addi %23, %83 : vector<1x256xi32>
    %c16_i32_39 = arith.constant 16 : i32
    %85 = vector.broadcast %c16_i32_39 : i32 to vector<1x256xi32>
    %86 = arith.cmpi slt, %84, %85 : vector<1x256xi32>
    %87 = arith.andi %82, %86 : vector<1x256xi1>
    %cst_40 = arith.constant 0.000000e+00 : f32
    %88 = vector.broadcast %cst_40 : f32 to vector<16x256xf32>
    %89 = vector.shape_cast %87 : vector<1x256xi1> to vector<1x256xi1>
    %90 = vector.broadcast %89 : vector<1x256xi1> to vector<16x256xi1>
    %91 = arith.select %90, %78, %88 : vector<16x256xi1>, vector<16x256xf32>
    %92 = arith.truncf %91 : vector<16x256xf32> to vector<16x256xbf16>
    %c80 = arith.constant 80 : index
    %c0_41 = arith.constant 0 : index
    %93 = vector.load %arg7[%c80, %c0_41] : memref<144x256xbf16, #tpu.memory_space<vmem>>, vector<16x256xbf16>
    tpu.vector_store %arg7[%c80, %c0_41], %92 {strides = array<i32>} : memref<144x256xbf16, #tpu.memory_space<vmem>>, vector<16x256xbf16>,
    %c0_42 = arith.constant 0 : index
    %c143 = arith.constant 143 : index
    %94 = vector.load %arg6[%c0_42, %c143] : memref<16x512xf32, #tpu.memory_space<vmem>>, vector<16x256xf32>
    %c-1_i32_43 = arith.constant -1 : i32
    %95 = vector.broadcast %c-1_i32_43 : i32 to vector<1x256xi32>
    %96 = arith.addi %23, %95 : vector<1x256xi32>
    %c0_i32_44 = arith.constant 0 : i32
    %97 = vector.broadcast %c0_i32_44 : i32 to vector<1x256xi32>
    %98 = arith.cmpi sge, %96, %97 : vector<1x256xi32>
    %c-1_i32_45 = arith.constant -1 : i32
    %99 = vector.broadcast %c-1_i32_45 : i32 to vector<1x256xi32>
    %100 = arith.addi %23, %99 : vector<1x256xi32>
    %c16_i32_46 = arith.constant 16 : i32
    %101 = vector.broadcast %c16_i32_46 : i32 to vector<1x256xi32>
    %102 = arith.cmpi slt, %100, %101 : vector<1x256xi32>
    %103 = arith.andi %98, %102 : vector<1x256xi1>
    %cst_47 = arith.constant 0.000000e+00 : f32
    %104 = vector.broadcast %cst_47 : f32 to vector<16x256xf32>
    %105 = vector.shape_cast %103 : vector<1x256xi1> to vector<1x256xi1>
    %106 = vector.broadcast %105 : vector<1x256xi1> to vector<16x256xi1>
    %107 = arith.select %106, %94, %104 : vector<16x256xi1>, vector<16x256xf32>
    %108 = arith.truncf %107 : vector<16x256xf32> to vector<16x256xbf16>
    %c96 = arith.constant 96 : index
    %c0_48 = arith.constant 0 : index
    %109 = vector.load %arg7[%c96, %c0_48] : memref<144x256xbf16, #tpu.memory_space<vmem>>, vector<16x256xbf16>
    tpu.vector_store %arg7[%c96, %c0_48], %108 {strides = array<i32>} : memref<144x256xbf16, #tpu.memory_space<vmem>>, vector<16x256xbf16>,
    %c0_49 = arith.constant 0 : index
    %c144 = arith.constant 144 : index
    %110 = vector.load %arg6[%c0_49, %c144] : memref<16x512xf32, #tpu.memory_space<vmem>>, vector<16x256xf32>
    %111 = arith.truncf %110 : vector<16x256xf32> to vector<16x256xbf16>
    %c112_50 = arith.constant 112 : index
    %c0_51 = arith.constant 0 : index
    %112 = vector.load %arg7[%c112_50, %c0_51] : memref<144x256xbf16, #tpu.memory_space<vmem>>, vector<16x256xbf16>
    tpu.vector_store %arg7[%c112_50, %c0_51], %111 {strides = array<i32>} : memref<144x256xbf16, #tpu.memory_space<vmem>>, vector<16x256xbf16>,
    %c0_52 = arith.constant 0 : index
    %c145 = arith.constant 145 : index
    %113 = vector.load %arg6[%c0_52, %c145] : memref<16x512xf32, #tpu.memory_space<vmem>>, vector<16x256xf32>
    %c1_i32_53 = arith.constant 1 : i32
    %114 = vector.broadcast %c1_i32_53 : i32 to vector<1x256xi32>
    %115 = arith.addi %23, %114 : vector<1x256xi32>
    %c0_i32_54 = arith.constant 0 : i32
    %116 = vector.broadcast %c0_i32_54 : i32 to vector<1x256xi32>
    %117 = arith.cmpi sge, %115, %116 : vector<1x256xi32>
    %c1_i32_55 = arith.constant 1 : i32
    %118 = vector.broadcast %c1_i32_55 : i32 to vector<1x256xi32>
    %119 = arith.addi %23, %118 : vector<1x256xi32>
    %c16_i32_56 = arith.constant 16 : i32
    %120 = vector.broadcast %c16_i32_56 : i32 to vector<1x256xi32>
    %121 = arith.cmpi slt, %119, %120 : vector<1x256xi32>
    %122 = arith.andi %117, %121 : vector<1x256xi1>
    %cst_57 = arith.constant 0.000000e+00 : f32
    %123 = vector.broadcast %cst_57 : f32 to vector<16x256xf32>
    %124 = vector.shape_cast %122 : vector<1x256xi1> to vector<1x256xi1>
    %125 = vector.broadcast %124 : vector<1x256xi1> to vector<16x256xi1>
    %126 = arith.select %125, %113, %123 : vector<16x256xi1>, vector<16x256xf32>
    %127 = arith.truncf %126 : vector<16x256xf32> to vector<16x256xbf16>
    %c128_58 = arith.constant 128 : index
    %c0_59 = arith.constant 0 : index
    %128 = vector.load %arg7[%c128_58, %c0_59] : memref<144x256xbf16, #tpu.memory_space<vmem>>, vector<16x256xbf16>
    tpu.vector_store %arg7[%c128_58, %c0_59], %127 {strides = array<i32>} : memref<144x256xbf16, #tpu.memory_space<vmem>>, vector<16x256xbf16>,
    %c0_60 = arith.constant 0 : index
    %c0_61 = arith.constant 0 : index
    %129 = vector.load %arg2[%c0_60, %c0_61] : memref<16x144xbf16, #tpu.memory_space<vmem>>, vector<16x144xbf16>
    %c0_62 = arith.constant 0 : index
    %c0_63 = arith.constant 0 : index
    %130 = vector.load %arg7[%c0_62, %c0_63] : memref<144x256xbf16, #tpu.memory_space<vmem>>, vector<144x256xbf16>
    %cst_64 = arith.constant dense<0.000000e+00> : vector<16x256xf32>
    %131 = tpu.matmul %129, %130, %cst_64 {dimension_numbers = #tpu.dot_dimension_numbers<[1], [0], [0], [1], [0, 0, 1, 1], [], []>} : vector<16x144xbf16>, vector<144x256xbf16>, vector<16x256xf32> -> vector<16x256xf32>
    %c0_65 = arith.constant 0 : index
    %c0_66 = arith.constant 0 : index
    %132 = vector.load %arg3[%c0_65, %c0_66] : memref<16x16xbf16, #tpu.memory_space<vmem>>, vector<16x16xbf16>
    %cst_67 = arith.constant dense<0.000000e+00> : vector<16x256xf32>
    %133 = tpu.matmul %132, %1, %cst_67 {dimension_numbers = #tpu.dot_dimension_numbers<[1], [0], [0], [1], [0, 0, 1, 1], [], []>} : vector<16x16xbf16>, vector<16x256xbf16>, vector<16x256xf32> -> vector<16x256xf32>
    %134 = arith.truncf %131 : vector<16x256xf32> to vector<16x256xbf16>
    %c0_68 = arith.constant 0 : index
    %c0_69 = arith.constant 0 : index
    %c0_70 = arith.constant 0 : index
    %135 = vector.load %arg4[%c0_68, %c0_69, %c0_70] : memref<1x16x256xbf16, #tpu.memory_space<vmem>>, vector<1x16x256xbf16>
    %136 = vector.shape_cast %135 : vector<1x16x256xbf16> to vector<16x256xbf16>
    %137 = vector.shape_cast %134 : vector<16x256xbf16> to vector<1x16x256xbf16>
    tpu.vector_store %arg4[%c0_68, %c0_69, %c0_70], %137 {strides = array<i32>} : memref<1x16x256xbf16, #tpu.memory_space<vmem>>, vector<1x16x256xbf16>,
    %cst_71 = arith.constant dense<0.000000e+00> : vector<16xf32>
    %138 = vector.multi_reduction <add>, %131, %cst_71 [1] : vector<16x256xf32> to vector<16xf32>
    %139 = vector.shape_cast %138 : vector<16xf32> to vector<16x1xf32>
    %140 = arith.mulf %131, %131 : vector<16x256xf32>
    %cst_72 = arith.constant dense<0.000000e+00> : vector<16xf32>
    %141 = vector.multi_reduction <add>, %140, %cst_72 [1] : vector<16x256xf32> to vector<16xf32>
    %142 = vector.shape_cast %141 : vector<16xf32> to vector<16x1xf32>
    %cst_73 = arith.constant dense<0.000000e+00> : vector<16xf32>
    %143 = vector.multi_reduction <add>, %133, %cst_73 [1] : vector<16x256xf32> to vector<16xf32>
    %144 = vector.shape_cast %143 : vector<16xf32> to vector<16x1xf32>
    %145 = arith.mulf %133, %133 : vector<16x256xf32>
    %cst_74 = arith.constant dense<0.000000e+00> : vector<16xf32>
    %146 = vector.multi_reduction <add>, %145, %cst_74 [1] : vector<16x256xf32> to vector<16xf32>
    %147 = vector.shape_cast %146 : vector<16xf32> to vector<16x1xf32>
    %148 = tpu.iota {dimensions = array<i32: 1>} : vector<16x4xi32>
    %c2_i32 = arith.constant 2 : i32
    %149 = vector.broadcast %c2_i32 : i32 to vector<16x4xi32>
    %150 = arith.cmpi eq, %148, %149 : vector<16x4xi32>
    %151 = vector.shape_cast %144 : vector<16x1xf32> to vector<16x1xf32>
    %152 = vector.broadcast %151 : vector<16x1xf32> to vector<16x4xf32>
    %153 = vector.shape_cast %147 : vector<16x1xf32> to vector<16x1xf32>
    %154 = vector.broadcast %153 : vector<16x1xf32> to vector<16x4xf32>
    %155 = arith.select %150, %152, %154 : vector<16x4xi1>, vector<16x4xf32>
    %c1_i32_75 = arith.constant 1 : i32
    %156 = vector.broadcast %c1_i32_75 : i32 to vector<16x4xi32>
    %157 = arith.cmpi eq, %148, %156 : vector<16x4xi32>
    %158 = vector.shape_cast %142 : vector<16x1xf32> to vector<16x1xf32>
    %159 = vector.broadcast %158 : vector<16x1xf32> to vector<16x4xf32>
    %160 = arith.select %157, %159, %155 : vector<16x4xi1>, vector<16x4xf32>
    %c0_i32_76 = arith.constant 0 : i32
    %161 = vector.broadcast %c0_i32_76 : i32 to vector<16x4xi32>
    %162 = arith.cmpi eq, %148, %161 : vector<16x4xi32>
    %163 = vector.shape_cast %139 : vector<16x1xf32> to vector<16x1xf32>
    %164 = vector.broadcast %163 : vector<16x1xf32> to vector<16x4xf32>
    %165 = arith.select %162, %164, %160 : vector<16x4xi1>, vector<16x4xf32>
    %c0_77 = arith.constant 0 : index
    %c0_78 = arith.constant 0 : index
    %c0_79 = arith.constant 0 : index
    %166 = vector.load %arg5[%c0_77, %c0_78, %c0_79] : memref<1x16x4xf32, #tpu.memory_space<vmem>>, vector<1x16x4xf32>
    %167 = vector.shape_cast %166 : vector<1x16x4xf32> to vector<16x4xf32>
    %168 = vector.shape_cast %165 : vector<16x4xf32> to vector<1x16x4xf32>
    tpu.vector_store %arg5[%c0_77, %c0_78, %c0_79], %168 {strides = array<i32>} : memref<1x16x4xf32, #tpu.memory_space<vmem>>, vector<1x16x4xf32>,
    return
  }
  func.func @transform_0(%arg0: i32) -> (i32, i32, i32) {
    %c0_i32 = arith.constant 0 : i32
    %c0_i32_0 = arith.constant 0 : i32
    %c0_i32_1 = arith.constant 0 : i32
    return %arg0, %c0_i32, %c0_i32_0 : i32, i32, i32
  }
  func.func @transform_1(%arg0: i32) -> (i32, i32) {
    %c0_i32 = arith.constant 0 : i32
    %c0_i32_0 = arith.constant 0 : i32
    %c0_i32_1 = arith.constant 0 : i32
    return %c0_i32, %c0_i32_0 : i32, i32
  }
  func.func @transform_2(%arg0: i32) -> (i32, i32) {
    %c0_i32 = arith.constant 0 : i32
    %c0_i32_0 = arith.constant 0 : i32
    %c0_i32_1 = arith.constant 0 : i32
    return %c0_i32, %c0_i32_0 : i32, i32
  }
  func.func @transform_3(%arg0: i32) -> (i32, i32, i32) {
    %c0_i32 = arith.constant 0 : i32
    %c0_i32_0 = arith.constant 0 : i32
    %c0_i32_1 = arith.constant 0 : i32
    return %arg0, %c0_i32, %c0_i32_0 : i32, i32, i32
  }
  func.func @transform_4(%arg0: i32) -> (i32, i32, i32) {
    %c0_i32 = arith.constant 0 : i32
    %c0_i32_0 = arith.constant 0 : i32
    %c0_i32_1 = arith.constant 0 : i32
    return %arg0, %c0_i32, %c0_i32_0 : i32, i32, i32
  }
}

module attributes {stable_mosaic.version = 11 : i64} {
  func.func @_pass2_kernel(%arg0: i32, %arg1: memref<1x16x256xbf16, #tpu.memory_space<vmem>>, %arg2: memref<16x144xbf16, #tpu.memory_space<vmem>>, %arg3: memref<16x1xf32, #tpu.memory_space<vmem>>, %arg4: memref<16x1xf32, #tpu.memory_space<vmem>>, %arg5: memref<1x16x256xbf16, #tpu.memory_space<vmem>>, %arg6: memref<1x16x2xf32, #tpu.memory_space<vmem>>, %arg7: memref<16x512xf32, #tpu.memory_space<vmem>>, %arg8: memref<144x256xbf16, #tpu.memory_space<vmem>>) attributes {dimension_semantics = [#tpu.dimension_semantics<parallel>], iteration_bounds = array<i64: 2>, scalar_prefetch = 0 : i64, scratch_operands = 2 : i64, tpu.core_type = #tpu.core_type<tc>, window_params = [{transform_indices = @transform_0, window_bounds = array<i64: 1, 16, 256>}, {pipeline_mode = #tpu.pipeline_mode<synchronous>, transform_indices = @transform_1, window_bounds = array<i64: 16, 144>}, {pipeline_mode = #tpu.pipeline_mode<synchronous>, transform_indices = @transform_2, window_bounds = array<i64: 16, 1>}, {pipeline_mode = #tpu.pipeline_mode<synchronous>, transform_indices = @transform_3, window_bounds = array<i64: 16, 1>}, {transform_indices = @transform_4, window_bounds = array<i64: 1, 16, 256>}, {transform_indices = @transform_5, window_bounds = array<i64: 1, 16, 2>}]} {
    %c0 = arith.constant 0 : index
    %c0_0 = arith.constant 0 : index
    %c0_1 = arith.constant 0 : index
    %0 = vector.load %arg1[%c0, %c0_0, %c0_1] : memref<1x16x256xbf16, #tpu.memory_space<vmem>>, vector<1x16x256xbf16>
    %1 = vector.shape_cast %0 : vector<1x16x256xbf16> to vector<16x256xbf16>
    %2 = arith.extf %1 : vector<16x256xbf16> to vector<16x256xf32>
    %c0_2 = arith.constant 0 : index
    %c0_3 = arith.constant 0 : index
    %3 = vector.load %arg3[%c0_2, %c0_3] : memref<16x1xf32, #tpu.memory_space<vmem>>, vector<16x1xf32>
    %4 = vector.broadcast %3 : vector<16x1xf32> to vector<16x256xf32>
    %5 = arith.mulf %2, %4 : vector<16x256xf32>
    %c0_4 = arith.constant 0 : index
    %c0_5 = arith.constant 0 : index
    %6 = vector.load %arg4[%c0_4, %c0_5] : memref<16x1xf32, #tpu.memory_space<vmem>>, vector<16x1xf32>
    %7 = vector.broadcast %6 : vector<16x1xf32> to vector<16x256xf32>
    %8 = arith.addf %5, %7 : vector<16x256xf32>
    %cst = arith.constant 0.000000e+00 : f32
    %9 = vector.broadcast %cst : f32 to vector<16x256xf32>
    %10 = arith.maximumf %8, %9 : vector<16x256xf32>
    %cst_6 = arith.constant 0.000000e+00 : f32
    %11 = vector.broadcast %cst_6 : f32 to vector<16x128xf32>
    %c0_7 = arith.constant 0 : index
    %c0_8 = arith.constant 0 : index
    %12 = vector.load %arg7[%c0_7, %c0_8] : memref<16x512xf32, #tpu.memory_space<vmem>>, vector<16x128xf32>
    tpu.vector_store %arg7[%c0_7, %c0_8], %11 {strides = array<i32>} : memref<16x512xf32, #tpu.memory_space<vmem>>, vector<16x128xf32>,
    %c0_9 = arith.constant 0 : index
    %c384 = arith.constant 384 : index
    %13 = vector.load %arg7[%c0_9, %c384] : memref<16x512xf32, #tpu.memory_space<vmem>>, vector<16x128xf32>
    tpu.vector_store %arg7[%c0_9, %c384], %11 {strides = array<i32>} : memref<16x512xf32, #tpu.memory_space<vmem>>, vector<16x128xf32>,
    %c0_10 = arith.constant 0 : index
    %c128 = arith.constant 128 : index
    %14 = vector.load %arg7[%c0_10, %c128] : memref<16x512xf32, #tpu.memory_space<vmem>>, vector<16x256xf32>
    tpu.vector_store %arg7[%c0_10, %c128], %10 {strides = array<i32>} : memref<16x512xf32, #tpu.memory_space<vmem>>, vector<16x256xf32>,
    %15 = tpu.iota {dimensions = array<i32: 1>} : vector<1x256xi32>
    %c16_i32 = arith.constant 16 : i32
    %c0_i32 = arith.constant 0 : i32
    %16 = arith.cmpi eq, %c16_i32, %c0_i32 : i32
    %c1_i32 = arith.constant 1 : i32
    %17 = arith.select %16, %c1_i32, %c16_i32 : i32
    %18 = vector.broadcast %17 : i32 to vector<1x256xi32>
    %19 = arith.remsi %15, %18 : vector<1x256xi32>
    %c0_i32_11 = arith.constant 0 : i32
    %20 = vector.broadcast %c0_i32_11 : i32 to vector<1x256xi32>
    %21 = arith.cmpi ne, %19, %20 : vector<1x256xi32>
    %c0_i32_12 = arith.constant 0 : i32
    %22 = vector.broadcast %c0_i32_12 : i32 to vector<1x256xi32>
    %23 = arith.cmpi slt, %19, %22 : vector<1x256xi32>
    %c0_i32_13 = arith.constant 0 : i32
    %24 = arith.cmpi slt, %17, %c0_i32_13 : i32
    %25 = vector.broadcast %24 : i1 to vector<1x256xi1>
    %26 = vector.broadcast %25 : vector<1x256xi1> to vector<1x256xi1>
    %27 = arith.xori %23, %26 : vector<1x256xi1>
    %28 = arith.andi %27, %21 : vector<1x256xi1>
    %29 = vector.broadcast %17 : i32 to vector<1x256xi32>
    %30 = arith.addi %19, %29 : vector<1x256xi32>
    %31 = arith.select %28, %30, %19 : vector<1x256xi1>, vector<1x256xi32>
    %c0_14 = arith.constant 0 : index
    %c111 = arith.constant 111 : index
    %32 = vector.load %arg7[%c0_14, %c111] : memref<16x512xf32, #tpu.memory_space<vmem>>, vector<16x256xf32>
    %c-1_i32 = arith.constant -1 : i32
    %33 = vector.broadcast %c-1_i32 : i32 to vector<1x256xi32>
    %34 = arith.addi %31, %33 : vector<1x256xi32>
    %c0_i32_15 = arith.constant 0 : i32
    %35 = vector.broadcast %c0_i32_15 : i32 to vector<1x256xi32>
    %36 = arith.cmpi sge, %34, %35 : vector<1x256xi32>
    %c-1_i32_16 = arith.constant -1 : i32
    %37 = vector.broadcast %c-1_i32_16 : i32 to vector<1x256xi32>
    %38 = arith.addi %31, %37 : vector<1x256xi32>
    %c16_i32_17 = arith.constant 16 : i32
    %39 = vector.broadcast %c16_i32_17 : i32 to vector<1x256xi32>
    %40 = arith.cmpi slt, %38, %39 : vector<1x256xi32>
    %41 = arith.andi %36, %40 : vector<1x256xi1>
    %cst_18 = arith.constant 0.000000e+00 : f32
    %42 = vector.broadcast %cst_18 : f32 to vector<16x256xf32>
    %43 = vector.shape_cast %41 : vector<1x256xi1> to vector<1x256xi1>
    %44 = vector.broadcast %43 : vector<1x256xi1> to vector<16x256xi1>
    %45 = arith.select %44, %32, %42 : vector<16x256xi1>, vector<16x256xf32>
    %46 = arith.truncf %45 : vector<16x256xf32> to vector<16x256xbf16>
    %c0_19 = arith.constant 0 : index
    %c0_20 = arith.constant 0 : index
    %47 = vector.load %arg8[%c0_19, %c0_20] : memref<144x256xbf16, #tpu.memory_space<vmem>>, vector<16x256xbf16>
    tpu.vector_store %arg8[%c0_19, %c0_20], %46 {strides = array<i32>} : memref<144x256xbf16, #tpu.memory_space<vmem>>, vector<16x256xbf16>,
    %c0_21 = arith.constant 0 : index
    %c112 = arith.constant 112 : index
    %48 = vector.load %arg7[%c0_21, %c112] : memref<16x512xf32, #tpu.memory_space<vmem>>, vector<16x256xf32>
    %49 = arith.truncf %48 : vector<16x256xf32> to vector<16x256xbf16>
    %c16 = arith.constant 16 : index
    %c0_22 = arith.constant 0 : index
    %50 = vector.load %arg8[%c16, %c0_22] : memref<144x256xbf16, #tpu.memory_space<vmem>>, vector<16x256xbf16>
    tpu.vector_store %arg8[%c16, %c0_22], %49 {strides = array<i32>} : memref<144x256xbf16, #tpu.memory_space<vmem>>, vector<16x256xbf16>,
    %c0_23 = arith.constant 0 : index
    %c113 = arith.constant 113 : index
    %51 = vector.load %arg7[%c0_23, %c113] : memref<16x512xf32, #tpu.memory_space<vmem>>, vector<16x256xf32>
    %c1_i32_24 = arith.constant 1 : i32
    %52 = vector.broadcast %c1_i32_24 : i32 to vector<1x256xi32>
    %53 = arith.addi %31, %52 : vector<1x256xi32>
    %c0_i32_25 = arith.constant 0 : i32
    %54 = vector.broadcast %c0_i32_25 : i32 to vector<1x256xi32>
    %55 = arith.cmpi sge, %53, %54 : vector<1x256xi32>
    %c1_i32_26 = arith.constant 1 : i32
    %56 = vector.broadcast %c1_i32_26 : i32 to vector<1x256xi32>
    %57 = arith.addi %31, %56 : vector<1x256xi32>
    %c16_i32_27 = arith.constant 16 : i32
    %58 = vector.broadcast %c16_i32_27 : i32 to vector<1x256xi32>
    %59 = arith.cmpi slt, %57, %58 : vector<1x256xi32>
    %60 = arith.andi %55, %59 : vector<1x256xi1>
    %cst_28 = arith.constant 0.000000e+00 : f32
    %61 = vector.broadcast %cst_28 : f32 to vector<16x256xf32>
    %62 = vector.shape_cast %60 : vector<1x256xi1> to vector<1x256xi1>
    %63 = vector.broadcast %62 : vector<1x256xi1> to vector<16x256xi1>
    %64 = arith.select %63, %51, %61 : vector<16x256xi1>, vector<16x256xf32>
    %65 = arith.truncf %64 : vector<16x256xf32> to vector<16x256xbf16>
    %c32 = arith.constant 32 : index
    %c0_29 = arith.constant 0 : index
    %66 = vector.load %arg8[%c32, %c0_29] : memref<144x256xbf16, #tpu.memory_space<vmem>>, vector<16x256xbf16>
    tpu.vector_store %arg8[%c32, %c0_29], %65 {strides = array<i32>} : memref<144x256xbf16, #tpu.memory_space<vmem>>, vector<16x256xbf16>,
    %c0_30 = arith.constant 0 : index
    %c127 = arith.constant 127 : index
    %67 = vector.load %arg7[%c0_30, %c127] : memref<16x512xf32, #tpu.memory_space<vmem>>, vector<16x256xf32>
    %c-1_i32_31 = arith.constant -1 : i32
    %68 = vector.broadcast %c-1_i32_31 : i32 to vector<1x256xi32>
    %69 = arith.addi %31, %68 : vector<1x256xi32>
    %c0_i32_32 = arith.constant 0 : i32
    %70 = vector.broadcast %c0_i32_32 : i32 to vector<1x256xi32>
    %71 = arith.cmpi sge, %69, %70 : vector<1x256xi32>
    %c-1_i32_33 = arith.constant -1 : i32
    %72 = vector.broadcast %c-1_i32_33 : i32 to vector<1x256xi32>
    %73 = arith.addi %31, %72 : vector<1x256xi32>
    %c16_i32_34 = arith.constant 16 : i32
    %74 = vector.broadcast %c16_i32_34 : i32 to vector<1x256xi32>
    %75 = arith.cmpi slt, %73, %74 : vector<1x256xi32>
    %76 = arith.andi %71, %75 : vector<1x256xi1>
    %cst_35 = arith.constant 0.000000e+00 : f32
    %77 = vector.broadcast %cst_35 : f32 to vector<16x256xf32>
    %78 = vector.shape_cast %76 : vector<1x256xi1> to vector<1x256xi1>
    %79 = vector.broadcast %78 : vector<1x256xi1> to vector<16x256xi1>
    %80 = arith.select %79, %67, %77 : vector<16x256xi1>, vector<16x256xf32>
    %81 = arith.truncf %80 : vector<16x256xf32> to vector<16x256xbf16>
    %c48 = arith.constant 48 : index
    %c0_36 = arith.constant 0 : index
    %82 = vector.load %arg8[%c48, %c0_36] : memref<144x256xbf16, #tpu.memory_space<vmem>>, vector<16x256xbf16>
    tpu.vector_store %arg8[%c48, %c0_36], %81 {strides = array<i32>} : memref<144x256xbf16, #tpu.memory_space<vmem>>, vector<16x256xbf16>,
    %c0_37 = arith.constant 0 : index
    %c128_38 = arith.constant 128 : index
    %83 = vector.load %arg7[%c0_37, %c128_38] : memref<16x512xf32, #tpu.memory_space<vmem>>, vector<16x256xf32>
    %84 = arith.truncf %83 : vector<16x256xf32> to vector<16x256xbf16>
    %c64 = arith.constant 64 : index
    %c0_39 = arith.constant 0 : index
    %85 = vector.load %arg8[%c64, %c0_39] : memref<144x256xbf16, #tpu.memory_space<vmem>>, vector<16x256xbf16>
    tpu.vector_store %arg8[%c64, %c0_39], %84 {strides = array<i32>} : memref<144x256xbf16, #tpu.memory_space<vmem>>, vector<16x256xbf16>,
    %c0_40 = arith.constant 0 : index
    %c129 = arith.constant 129 : index
    %86 = vector.load %arg7[%c0_40, %c129] : memref<16x512xf32, #tpu.memory_space<vmem>>, vector<16x256xf32>
    %c1_i32_41 = arith.constant 1 : i32
    %87 = vector.broadcast %c1_i32_41 : i32 to vector<1x256xi32>
    %88 = arith.addi %31, %87 : vector<1x256xi32>
    %c0_i32_42 = arith.constant 0 : i32
    %89 = vector.broadcast %c0_i32_42 : i32 to vector<1x256xi32>
    %90 = arith.cmpi sge, %88, %89 : vector<1x256xi32>
    %c1_i32_43 = arith.constant 1 : i32
    %91 = vector.broadcast %c1_i32_43 : i32 to vector<1x256xi32>
    %92 = arith.addi %31, %91 : vector<1x256xi32>
    %c16_i32_44 = arith.constant 16 : i32
    %93 = vector.broadcast %c16_i32_44 : i32 to vector<1x256xi32>
    %94 = arith.cmpi slt, %92, %93 : vector<1x256xi32>
    %95 = arith.andi %90, %94 : vector<1x256xi1>
    %cst_45 = arith.constant 0.000000e+00 : f32
    %96 = vector.broadcast %cst_45 : f32 to vector<16x256xf32>
    %97 = vector.shape_cast %95 : vector<1x256xi1> to vector<1x256xi1>
    %98 = vector.broadcast %97 : vector<1x256xi1> to vector<16x256xi1>
    %99 = arith.select %98, %86, %96 : vector<16x256xi1>, vector<16x256xf32>
    %100 = arith.truncf %99 : vector<16x256xf32> to vector<16x256xbf16>
    %c80 = arith.constant 80 : index
    %c0_46 = arith.constant 0 : index
    %101 = vector.load %arg8[%c80, %c0_46] : memref<144x256xbf16, #tpu.memory_space<vmem>>, vector<16x256xbf16>
    tpu.vector_store %arg8[%c80, %c0_46], %100 {strides = array<i32>} : memref<144x256xbf16, #tpu.memory_space<vmem>>, vector<16x256xbf16>,
    %c0_47 = arith.constant 0 : index
    %c143 = arith.constant 143 : index
    %102 = vector.load %arg7[%c0_47, %c143] : memref<16x512xf32, #tpu.memory_space<vmem>>, vector<16x256xf32>
    %c-1_i32_48 = arith.constant -1 : i32
    %103 = vector.broadcast %c-1_i32_48 : i32 to vector<1x256xi32>
    %104 = arith.addi %31, %103 : vector<1x256xi32>
    %c0_i32_49 = arith.constant 0 : i32
    %105 = vector.broadcast %c0_i32_49 : i32 to vector<1x256xi32>
    %106 = arith.cmpi sge, %104, %105 : vector<1x256xi32>
    %c-1_i32_50 = arith.constant -1 : i32
    %107 = vector.broadcast %c-1_i32_50 : i32 to vector<1x256xi32>
    %108 = arith.addi %31, %107 : vector<1x256xi32>
    %c16_i32_51 = arith.constant 16 : i32
    %109 = vector.broadcast %c16_i32_51 : i32 to vector<1x256xi32>
    %110 = arith.cmpi slt, %108, %109 : vector<1x256xi32>
    %111 = arith.andi %106, %110 : vector<1x256xi1>
    %cst_52 = arith.constant 0.000000e+00 : f32
    %112 = vector.broadcast %cst_52 : f32 to vector<16x256xf32>
    %113 = vector.shape_cast %111 : vector<1x256xi1> to vector<1x256xi1>
    %114 = vector.broadcast %113 : vector<1x256xi1> to vector<16x256xi1>
    %115 = arith.select %114, %102, %112 : vector<16x256xi1>, vector<16x256xf32>
    %116 = arith.truncf %115 : vector<16x256xf32> to vector<16x256xbf16>
    %c96 = arith.constant 96 : index
    %c0_53 = arith.constant 0 : index
    %117 = vector.load %arg8[%c96, %c0_53] : memref<144x256xbf16, #tpu.memory_space<vmem>>, vector<16x256xbf16>
    tpu.vector_store %arg8[%c96, %c0_53], %116 {strides = array<i32>} : memref<144x256xbf16, #tpu.memory_space<vmem>>, vector<16x256xbf16>,
    %c0_54 = arith.constant 0 : index
    %c144 = arith.constant 144 : index
    %118 = vector.load %arg7[%c0_54, %c144] : memref<16x512xf32, #tpu.memory_space<vmem>>, vector<16x256xf32>
    %119 = arith.truncf %118 : vector<16x256xf32> to vector<16x256xbf16>
    %c112_55 = arith.constant 112 : index
    %c0_56 = arith.constant 0 : index
    %120 = vector.load %arg8[%c112_55, %c0_56] : memref<144x256xbf16, #tpu.memory_space<vmem>>, vector<16x256xbf16>
    tpu.vector_store %arg8[%c112_55, %c0_56], %119 {strides = array<i32>} : memref<144x256xbf16, #tpu.memory_space<vmem>>, vector<16x256xbf16>,
    %c0_57 = arith.constant 0 : index
    %c145 = arith.constant 145 : index
    %121 = vector.load %arg7[%c0_57, %c145] : memref<16x512xf32, #tpu.memory_space<vmem>>, vector<16x256xf32>
    %c1_i32_58 = arith.constant 1 : i32
    %122 = vector.broadcast %c1_i32_58 : i32 to vector<1x256xi32>
    %123 = arith.addi %31, %122 : vector<1x256xi32>
    %c0_i32_59 = arith.constant 0 : i32
    %124 = vector.broadcast %c0_i32_59 : i32 to vector<1x256xi32>
    %125 = arith.cmpi sge, %123, %124 : vector<1x256xi32>
    %c1_i32_60 = arith.constant 1 : i32
    %126 = vector.broadcast %c1_i32_60 : i32 to vector<1x256xi32>
    %127 = arith.addi %31, %126 : vector<1x256xi32>
    %c16_i32_61 = arith.constant 16 : i32
    %128 = vector.broadcast %c16_i32_61 : i32 to vector<1x256xi32>
    %129 = arith.cmpi slt, %127, %128 : vector<1x256xi32>
    %130 = arith.andi %125, %129 : vector<1x256xi1>
    %cst_62 = arith.constant 0.000000e+00 : f32
    %131 = vector.broadcast %cst_62 : f32 to vector<16x256xf32>
    %132 = vector.shape_cast %130 : vector<1x256xi1> to vector<1x256xi1>
    %133 = vector.broadcast %132 : vector<1x256xi1> to vector<16x256xi1>
    %134 = arith.select %133, %121, %131 : vector<16x256xi1>, vector<16x256xf32>
    %135 = arith.truncf %134 : vector<16x256xf32> to vector<16x256xbf16>
    %c128_63 = arith.constant 128 : index
    %c0_64 = arith.constant 0 : index
    %136 = vector.load %arg8[%c128_63, %c0_64] : memref<144x256xbf16, #tpu.memory_space<vmem>>, vector<16x256xbf16>
    tpu.vector_store %arg8[%c128_63, %c0_64], %135 {strides = array<i32>} : memref<144x256xbf16, #tpu.memory_space<vmem>>, vector<16x256xbf16>,
    %c0_65 = arith.constant 0 : index
    %c0_66 = arith.constant 0 : index
    %137 = vector.load %arg2[%c0_65, %c0_66] : memref<16x144xbf16, #tpu.memory_space<vmem>>, vector<16x144xbf16>
    %c0_67 = arith.constant 0 : index
    %c0_68 = arith.constant 0 : index
    %138 = vector.load %arg8[%c0_67, %c0_68] : memref<144x256xbf16, #tpu.memory_space<vmem>>, vector<144x256xbf16>
    %cst_69 = arith.constant dense<0.000000e+00> : vector<16x256xf32>
    %139 = tpu.matmul %137, %138, %cst_69 {dimension_numbers = #tpu.dot_dimension_numbers<[1], [0], [0], [1], [0, 0, 1, 1], [], []>} : vector<16x144xbf16>, vector<144x256xbf16>, vector<16x256xf32> -> vector<16x256xf32>
    %140 = arith.truncf %139 : vector<16x256xf32> to vector<16x256xbf16>
    %c0_70 = arith.constant 0 : index
    %c0_71 = arith.constant 0 : index
    %c0_72 = arith.constant 0 : index
    %141 = vector.load %arg5[%c0_70, %c0_71, %c0_72] : memref<1x16x256xbf16, #tpu.memory_space<vmem>>, vector<1x16x256xbf16>
    %142 = vector.shape_cast %141 : vector<1x16x256xbf16> to vector<16x256xbf16>
    %143 = vector.shape_cast %140 : vector<16x256xbf16> to vector<1x16x256xbf16>
    tpu.vector_store %arg5[%c0_70, %c0_71, %c0_72], %143 {strides = array<i32>} : memref<1x16x256xbf16, #tpu.memory_space<vmem>>, vector<1x16x256xbf16>,
    %cst_73 = arith.constant dense<0.000000e+00> : vector<16xf32>
    %144 = vector.multi_reduction <add>, %139, %cst_73 [1] : vector<16x256xf32> to vector<16xf32>
    %145 = vector.shape_cast %144 : vector<16xf32> to vector<16x1xf32>
    %146 = arith.mulf %139, %139 : vector<16x256xf32>
    %cst_74 = arith.constant dense<0.000000e+00> : vector<16xf32>
    %147 = vector.multi_reduction <add>, %146, %cst_74 [1] : vector<16x256xf32> to vector<16xf32>
    %148 = vector.shape_cast %147 : vector<16xf32> to vector<16x1xf32>
    %149 = tpu.iota {dimensions = array<i32: 1>} : vector<16x2xi32>
    %c0_i32_75 = arith.constant 0 : i32
    %150 = vector.broadcast %c0_i32_75 : i32 to vector<16x2xi32>
    %151 = arith.cmpi eq, %149, %150 : vector<16x2xi32>
    %152 = vector.shape_cast %145 : vector<16x1xf32> to vector<16x1xf32>
    %153 = vector.broadcast %152 : vector<16x1xf32> to vector<16x2xf32>
    %154 = vector.shape_cast %148 : vector<16x1xf32> to vector<16x1xf32>
    %155 = vector.broadcast %154 : vector<16x1xf32> to vector<16x2xf32>
    %156 = arith.select %151, %153, %155 : vector<16x2xi1>, vector<16x2xf32>
    %c0_76 = arith.constant 0 : index
    %c0_77 = arith.constant 0 : index
    %c0_78 = arith.constant 0 : index
    %157 = vector.load %arg6[%c0_76, %c0_77, %c0_78] : memref<1x16x2xf32, #tpu.memory_space<vmem>>, vector<1x16x2xf32>
    %158 = vector.shape_cast %157 : vector<1x16x2xf32> to vector<16x2xf32>
    %159 = vector.shape_cast %156 : vector<16x2xf32> to vector<1x16x2xf32>
    tpu.vector_store %arg6[%c0_76, %c0_77, %c0_78], %159 {strides = array<i32>} : memref<1x16x2xf32, #tpu.memory_space<vmem>>, vector<1x16x2xf32>,
    return
  }
  func.func @transform_0(%arg0: i32) -> (i32, i32, i32) {
    %c0_i32 = arith.constant 0 : i32
    %c0_i32_0 = arith.constant 0 : i32
    %c0_i32_1 = arith.constant 0 : i32
    return %arg0, %c0_i32, %c0_i32_0 : i32, i32, i32
  }
  func.func @transform_1(%arg0: i32) -> (i32, i32) {
    %c0_i32 = arith.constant 0 : i32
    %c0_i32_0 = arith.constant 0 : i32
    %c0_i32_1 = arith.constant 0 : i32
    return %c0_i32, %c0_i32_0 : i32, i32
  }
  func.func @transform_2(%arg0: i32) -> (i32, i32) {
    %c0_i32 = arith.constant 0 : i32
    %c0_i32_0 = arith.constant 0 : i32
    %c0_i32_1 = arith.constant 0 : i32
    return %c0_i32, %c0_i32_0 : i32, i32
  }
  func.func @transform_3(%arg0: i32) -> (i32, i32) {
    %c0_i32 = arith.constant 0 : i32
    %c0_i32_0 = arith.constant 0 : i32
    %c0_i32_1 = arith.constant 0 : i32
    return %c0_i32, %c0_i32_0 : i32, i32
  }
  func.func @transform_4(%arg0: i32) -> (i32, i32, i32) {
    %c0_i32 = arith.constant 0 : i32
    %c0_i32_0 = arith.constant 0 : i32
    %c0_i32_1 = arith.constant 0 : i32
    return %arg0, %c0_i32, %c0_i32_0 : i32, i32, i32
  }
  func.func @transform_5(%arg0: i32) -> (i32, i32, i32) {
    %c0_i32 = arith.constant 0 : i32
    %c0_i32_0 = arith.constant 0 : i32
    %c0_i32_1 = arith.constant 0 : i32
    return %arg0, %c0_i32, %c0_i32_0 : i32, i32, i32
  }
}

module attributes {stable_mosaic.version = 11 : i64} {
  func.func @_pass3_kernel(%arg0: i32, %arg1: i32, %arg2: memref<1x16x128xbf16, #tpu.memory_space<vmem>>, %arg3: memref<1x16x128xbf16, #tpu.memory_space<vmem>>, %arg4: memref<16x16xbf16, #tpu.memory_space<vmem>>, %arg5: memref<16x1xf32, #tpu.memory_space<vmem>>, %arg6: memref<16x1xf32, #tpu.memory_space<vmem>>, %arg7: memref<16x1xf32, #tpu.memory_space<vmem>>, %arg8: memref<16x1xf32, #tpu.memory_space<vmem>>, %arg9: memref<1x16x128xf32, #tpu.memory_space<vmem>>) attributes {dimension_semantics = [#tpu.dimension_semantics<parallel>, #tpu.dimension_semantics<parallel>], iteration_bounds = array<i64: 2, 2>, scalar_prefetch = 0 : i64, scratch_operands = 0 : i64, tpu.core_type = #tpu.core_type<tc>, window_params = [{transform_indices = @transform_0, window_bounds = array<i64: 1, 16, 128>}, {transform_indices = @transform_1, window_bounds = array<i64: 1, 16, 128>}, {pipeline_mode = #tpu.pipeline_mode<synchronous>, transform_indices = @transform_2, window_bounds = array<i64: 16, 16>}, {pipeline_mode = #tpu.pipeline_mode<synchronous>, transform_indices = @transform_3, window_bounds = array<i64: 16, 1>}, {pipeline_mode = #tpu.pipeline_mode<synchronous>, transform_indices = @transform_4, window_bounds = array<i64: 16, 1>}, {pipeline_mode = #tpu.pipeline_mode<synchronous>, transform_indices = @transform_5, window_bounds = array<i64: 16, 1>}, {pipeline_mode = #tpu.pipeline_mode<synchronous>, transform_indices = @transform_6, window_bounds = array<i64: 16, 1>}, {transform_indices = @transform_7, window_bounds = array<i64: 1, 16, 128>}]} {
    %c0 = arith.constant 0 : index
    %c0_0 = arith.constant 0 : index
    %0 = vector.load %arg4[%c0, %c0_0] : memref<16x16xbf16, #tpu.memory_space<vmem>>, vector<16x16xbf16>
    %c0_1 = arith.constant 0 : index
    %c0_2 = arith.constant 0 : index
    %c0_3 = arith.constant 0 : index
    %1 = vector.load %arg3[%c0_1, %c0_2, %c0_3] : memref<1x16x128xbf16, #tpu.memory_space<vmem>>, vector<1x16x128xbf16>
    %2 = vector.shape_cast %1 : vector<1x16x128xbf16> to vector<16x128xbf16>
    %cst = arith.constant dense<0.000000e+00> : vector<16x128xf32>
    %3 = tpu.matmul %0, %2, %cst {dimension_numbers = #tpu.dot_dimension_numbers<[1], [0], [0], [1], [0, 0, 1, 1], [], []>} : vector<16x16xbf16>, vector<16x128xbf16>, vector<16x128xf32> -> vector<16x128xf32>
    %c0_4 = arith.constant 0 : index
    %c0_5 = arith.constant 0 : index
    %c0_6 = arith.constant 0 : index
    %4 = vector.load %arg2[%c0_4, %c0_5, %c0_6] : memref<1x16x128xbf16, #tpu.memory_space<vmem>>, vector<1x16x128xbf16>
    %5 = vector.shape_cast %4 : vector<1x16x128xbf16> to vector<16x128xbf16>
    %6 = arith.extf %5 : vector<16x128xbf16> to vector<16x128xf32>
    %c0_7 = arith.constant 0 : index
    %c0_8 = arith.constant 0 : index
    %7 = vector.load %arg5[%c0_7, %c0_8] : memref<16x1xf32, #tpu.memory_space<vmem>>, vector<16x1xf32>
    %8 = vector.broadcast %7 : vector<16x1xf32> to vector<16x128xf32>
    %9 = arith.mulf %6, %8 : vector<16x128xf32>
    %c0_9 = arith.constant 0 : index
    %c0_10 = arith.constant 0 : index
    %10 = vector.load %arg6[%c0_9, %c0_10] : memref<16x1xf32, #tpu.memory_space<vmem>>, vector<16x1xf32>
    %11 = vector.broadcast %10 : vector<16x1xf32> to vector<16x128xf32>
    %12 = arith.addf %9, %11 : vector<16x128xf32>
    %c0_11 = arith.constant 0 : index
    %c0_12 = arith.constant 0 : index
    %13 = vector.load %arg7[%c0_11, %c0_12] : memref<16x1xf32, #tpu.memory_space<vmem>>, vector<16x1xf32>
    %14 = vector.broadcast %13 : vector<16x1xf32> to vector<16x128xf32>
    %15 = arith.mulf %3, %14 : vector<16x128xf32>
    %16 = arith.addf %12, %15 : vector<16x128xf32>
    %c0_13 = arith.constant 0 : index
    %c0_14 = arith.constant 0 : index
    %17 = vector.load %arg8[%c0_13, %c0_14] : memref<16x1xf32, #tpu.memory_space<vmem>>, vector<16x1xf32>
    %18 = vector.broadcast %17 : vector<16x1xf32> to vector<16x128xf32>
    %19 = arith.addf %16, %18 : vector<16x128xf32>
    %cst_15 = arith.constant 0.000000e+00 : f32
    %20 = vector.broadcast %cst_15 : f32 to vector<16x128xf32>
    %21 = arith.maximumf %19, %20 : vector<16x128xf32>
    %c0_16 = arith.constant 0 : index
    %c0_17 = arith.constant 0 : index
    %c0_18 = arith.constant 0 : index
    %22 = vector.load %arg9[%c0_16, %c0_17, %c0_18] : memref<1x16x128xf32, #tpu.memory_space<vmem>>, vector<1x16x128xf32>
    %23 = vector.shape_cast %22 : vector<1x16x128xf32> to vector<16x128xf32>
    %24 = vector.shape_cast %21 : vector<16x128xf32> to vector<1x16x128xf32>
    tpu.vector_store %arg9[%c0_16, %c0_17, %c0_18], %24 {strides = array<i32>} : memref<1x16x128xf32, #tpu.memory_space<vmem>>, vector<1x16x128xf32>,
    return
  }
  func.func @transform_0(%arg0: i32, %arg1: i32) -> (i32, i32, i32) {
    %c0_i32 = arith.constant 0 : i32
    %c0_i32_0 = arith.constant 0 : i32
    return %arg0, %c0_i32, %arg1 : i32, i32, i32
  }
  func.func @transform_1(%arg0: i32, %arg1: i32) -> (i32, i32, i32) {
    %c0_i32 = arith.constant 0 : i32
    %c0_i32_0 = arith.constant 0 : i32
    return %arg0, %c0_i32, %arg1 : i32, i32, i32
  }
  func.func @transform_2(%arg0: i32, %arg1: i32) -> (i32, i32) {
    %c0_i32 = arith.constant 0 : i32
    %c0_i32_0 = arith.constant 0 : i32
    %c0_i32_1 = arith.constant 0 : i32
    return %c0_i32, %c0_i32_0 : i32, i32
  }
  func.func @transform_3(%arg0: i32, %arg1: i32) -> (i32, i32) {
    %c0_i32 = arith.constant 0 : i32
    %c0_i32_0 = arith.constant 0 : i32
    %c0_i32_1 = arith.constant 0 : i32
    return %c0_i32, %c0_i32_0 : i32, i32
  }
  func.func @transform_4(%arg0: i32, %arg1: i32) -> (i32, i32) {
    %c0_i32 = arith.constant 0 : i32
    %c0_i32_0 = arith.constant 0 : i32
    %c0_i32_1 = arith.constant 0 : i32
    return %c0_i32, %c0_i32_0 : i32, i32
  }
  func.func @transform_5(%arg0: i32, %arg1: i32) -> (i32, i32) {
    %c0_i32 = arith.constant 0 : i32
    %c0_i32_0 = arith.constant 0 : i32
    %c0_i32_1 = arith.constant 0 : i32
    return %c0_i32, %c0_i32_0 : i32, i32
  }
  func.func @transform_6(%arg0: i32, %arg1: i32) -> (i32, i32) {
    %c0_i32 = arith.constant 0 : i32
    %c0_i32_0 = arith.constant 0 : i32
    %c0_i32_1 = arith.constant 0 : i32
    return %c0_i32, %c0_i32_0 : i32, i32
  }
  func.func @transform_7(%arg0: i32, %arg1: i32) -> (i32, i32, i32) {
    %c0_i32 = arith.constant 0 : i32
    %c0_i32_0 = arith.constant 0 : i32
    return %arg0, %c0_i32, %arg1 : i32, i32, i32
  }
}

</mosaic_0001>

<bundles_post_ra>
// kernel: residual_forward.5
= control target key start
LH: loop header
LB: loop body
LE: loop exit
PB: predicated region body
PF: predicated region fallthrough
CT: control target
= control target key end

     0   :  { %s872_s24 = smov 0   ;;  %s874_s25 = smov 0   ;;  %s1017_s0 = inlined_call_operand.vmem [shape: bf16[2,16,256], index: 0, kind: input, shape index: {}]   ;;  %s1018_s1 = inlined_call_operand.vmem [shape: bf16[2,16,256], index: 1, kind: input, shape index: {}]   ;;  %s1019_s2 = inlined_call_operand.vmem [shape: bf16[16,16], index: 2, kind: input, shape index: {}]   ;;  %s1020_s3 = inlined_call_operand.vmem [shape: f32[16,1], index: 3, kind: input, shape index: {}]   ;;  %s1021_s4 = inlined_call_operand.vmem [shape: f32[16,1], index: 4, kind: input, shape index: {}]   ;;  %s1022_s5 = inlined_call_operand.vmem [shape: f32[16,1], index: 5, kind: input, shape index: {}]   ;;  %s1023_s6 = inlined_call_operand.vmem [shape: f32[16,1], index: 6, kind: input, shape index: {}]   ;;  %s1024_s7 = inlined_call_operand.vmem [shape: f32[2,16,256], index: 7, kind: output, shape index: {}]  }
   0x1   :  { %s876_s26 = smov 0   ;;  %s878_s27 = smov 0  }
   0x2   :  { %s880_s28 = smov 0   ;;  %s882_s29 = smov 0  }
   0x3   :  { %s884_s30 = smov 0  }
   0x4 LB: > { %s26_s8 = sadd.s32 1, %s819_s28  ;;  %s29_s9 = sadd.s32 1, %s823_s29  ;;  %s827_s30 = sphi %s884_s30, %s17_s30   ;;  %s823_s29 = sphi %s882_s29, %s1035_s29   ;;  %s819_s28 = sphi %s880_s28, %s1034_s28   ;;  %s815_s27 = sphi %s878_s27, %s1033_s27   ;;  %s811_s26 = sphi %s876_s26, %s1032_s26   ;;  %s807_s25 = sphi %s874_s25, %s1031_s25   ;;  %s803_s24 = sphi %s872_s24, %s1030_s24  }
   0x5   : > { %p27_p0 = scmp.ge.s32.totalorder %s26_s8, 2  ;;  %s676_s10 = sadd.s32 4294967295, %s827_s30  }
   0x6   : > { %p45_p1 = scmp.ne.s32.totalorder %s807_s25, %s803_s24  ;;  %p46_p2 = scmp.eq.s32.totalorder %s827_s30, 0 }
   0x7   : > { %s1037_s8 = smov (%p27_p0, %s26_s8), 0  ;;  %s1039_s9 = smov (!%p27_p0, %s29_s9), %s823_s29 }
   0x8   : > { %p31_p3 = scmp.ge.s32.totalorder %s1039_s9, 2  ;;  %p210_p4 = scmp.eq.s32.totalorder %s676_s10, 3 }
   0x9   : > { %s34_s11 = ssub.s32 %s819_s28, %s1037_s8  ;;  %p918_p5 = por %p46_p2, %p45_p1 }
   0xa   : > { %s1041_s9 = smov (%p31_p3, %s1039_s9), 0  ;;  %p924_p6 = por %p210_p4, %p45_p1 }
   0xb   : > { %1027 = sst [smem:[#allocation5_spill]] %s1041_s9  ;;  %s33_s14 = ssub.s32 %s823_s29, %s1041_s9 }
   0xc   : > { %s35_s15 = sor.u32 %s34_s11, %s33_s14  ;;  %s38_s16 = sadd.s32 1, %s807_s25 }
   0xd   : > { %p36_p7 = scmp.eq.s32.totalorder %s35_s15, 0  ;;  %p679_p8 = scmp.ge.s32.totalorder %s827_s30, 4 }
   0xf   : > { %s932_s17 = scalar_select %p36_p7, %s807_s25, %s38_s16  }
  0x10   : > { %247 = sbr.rel (%p679_p8) target bundleno = 35 (0x23), region = 36 }
  0x15   : > { %250 = sbr.rel (!%p918_p5) target bundleno = 28 (0x1c), region = 40  ;;  %s252_s18 = sand.u32 (%p918_p5), 1, %s807_s25  }
  0x16   : > { %s681_s19 = sshll.u32 (%p918_p5), %s823_s29, 2  ;;  %s680_s20 = sshll.u32 (%p918_p5), %s252_s18, 3 }
  0x17   : > { %s256_s21 = sadd.s32 (%p918_p5), %s819_s28, %s681_s19  ;;  %s254_s14 = scalar_lea.vmem (%p918_p5), [#allocation2], %s680_s20 }
  0x18   : > { %s682_s22 = sshll.u32 (%p918_p5), %s256_s21, 2 }
  0x19   : > { %s258_s11 = scalar_lea.vmem (%p918_p5), %s1017_s0, %s682_s22 }
  0x1a   : > { %v275_v0 = vld [vmem:[%s258_s11] sm:$0xf]  ;;  %v277_v1 = vld [vmem:[%s258_s11 + $0x8] sm:$0xf] }
  0x1b   : > { %276 = vst [vmem:[%s254_s14] sm:$0xf] %v275_v0  ;;  %278 = vst [vmem:[%s254_s14 + $0x4] sm:$0xf] %v277_v1 }
  0x1c PF: > { %306 = sbr.rel (!%p918_p5) target bundleno = 35 (0x23), region = 81  ;;  %s308_s15 = sand.u32 (%p918_p5), 1, %s807_s25  }
  0x1d   : > { %s684_s16 = sshll.u32 (%p918_p5), %s823_s29, 2  ;;  %s683_s18 = sshll.u32 (%p918_p5), %s308_s15, 3 }
  0x1e   : > { %s312_s19 = sadd.s32 (%p918_p5), %s819_s28, %s684_s16  ;;  %s310_s20 = scalar_lea.vmem (%p918_p5), [#allocation3], %s683_s18 }
  0x1f   : > { %s685_s21 = sshll.u32 (%p918_p5), %s312_s19, 2 }
  0x20   : > { %s314_s22 = scalar_lea.vmem (%p918_p5), %s1018_s1, %s685_s21 }
  0x21   : > { %v331_v2 = vld [vmem:[%s314_s22] sm:$0xf]  ;;  %v333_v3 = vld [vmem:[%s314_s22 + $0x8] sm:$0xf] }
  0x22   : > { %332 = vst [vmem:[%s310_s20] sm:$0xf] %v331_v2  ;;  %334 = vst [vmem:[%s310_s20 + $0x4] sm:$0xf] %v333_v3 }
  0x23 PF: > { %p686_p9 = scmp.ge.s32.totalorder %s827_s30, 1  ;;  %p361_p10 = scmp.lt.s32.totalorder %s827_s30, 5 }
  0x25   : > { %p362_p11 = pnand %p686_p9, %p361_p10 }
  0x26   : > { %s368_s12 = sand.u32 (!%p362_p11), 1, %s803_s24  }
  0x27   : > { %365 = sbr.rel (%p362_p11) target bundleno = 266 (0x10a), region = 122  ;;  %s956_s9 = sshll.u32 (!%p362_p11), %s368_s12, 3 }
  0x28   : > { %s377_s16 = scalar_lea.vmem (!%p362_p11), [#allocation3], %s956_s9  ;;  %s370_s23 = scalar_lea.vmem (!%p362_p11), [#allocation2], %s956_s9 }
  0x29   : > { %s689_s22 = sshll.u32 (!%p362_p11), %s368_s12, 4 }
  0x2a   : > { %s408_s9 = scalar_lea.vmem (!%p362_p11), [#allocation4], %s689_s22 }
  0x2c   : > { %v829_v4 = vmov 0.0   ;;  %vm830_vm0 = vmmov 0   ;;  %v831_v5 = vmov 0   ;;  %v488_v6 = vld [vmem:[%s1021_s4] sm:$0xff]  ;;  %v771_v8 = vld [vmem:[%s377_s16] sm:$0xff]   ;;  %v489_v10 = vld [vmem:[%s1021_s4 + $0x8] sm:$0xff] }
  0x2d   : > { %704 = vmatprep.subr.bf16.mxu0 %v829_v4  ;;  %706 = vmatprep.mubr.msk.bf16.mxu0 %vm830_vm0, %v829_v4  ;;  %v474_v7 = vld [vmem:[%s1020_s3] sm:$0xff]  ;;  %v475_v11 = vld [vmem:[%s1020_s3 + $0x8] sm:$0xff]  ;;  %vm425_vm1 = vcmask 130048   ;;  %s694_s24 = sshll.u32 (%p924_p6), %s815_s27, 2 }
  0x2e   : > { %770 = vset.pattern.permute.xlu1 %v831_v5  ;;  %769 = vset.pattern.permute.xlu0 %v831_v5  ;;  %v772_v9 = vld [vmem:[%s1019_s2] sm:$0xff]   ;;  %v503_v12 = vld [vmem:[%s1022_s5 + $0x8] sm:$0xff]  ;;  %s544_s12 = sadd.s32 (%p924_p6), %s811_s26, %s694_s24 }
  0x2f   : > { %492 = vperm.xlu1 %770, %v488_v6   ;;  %478 = vperm.xlu0 %769, %v474_v7   ;;  %v502_v13 = vld [vmem:[%s1022_s5] sm:$0xff]  ;;  %v519_v14 = vld [vmem:[%s1023_s6 + $0x8] sm:$0xff]  ;;  %s695_s20 = sshll.u32 (%p924_p6), %s544_s12, 3 }
  0x30   : > { %705 = vmatpush3.bf16.msra.mxu0 %v771_v8  ;;  %v518_v15 = vld [vmem:[%s1023_s6] sm:$0xff]  ;;  %s546_s14 = scalar_lea.vmem (%p924_p6), %s1024_s7, %s695_s20 }
  0x31   : > { %v699_v18 = vld [vmem:[%s370_s23] sm:$0xff]  }
  0x32   : > { %v700_v20 = vunpack.c.l.bf16 %v699_v18  ;;  %v701_v23 = vunpack.c.h.bf16 %v699_v18 }
  0x33   : > { %497 = vperm.xlu1 %770, %v489_v10   ;;  %483 = vperm.xlu0 %769, %v475_v11  }
  0x34   : > { %707 = vmatmul.mubr.msk.bf16.vlgmr.msra.gmra.mxu0 %vm425_vm1, %v772_v9 }
  0x37   : > { %511 = vperm.xlu1 %770, %v503_v12   ;;  %506 = vperm.xlu0 %769, %v502_v13  }
  0x3b   : > { %527 = vperm.xlu1 %770, %v519_v14   ;;  %522 = vperm.xlu0 %769, %v518_v15  }
  0xaa   : > { %v479_v16 = vpop.permute.xlu0 %478  ;;  %v493_v17 = vpop.permute.xlu1 %492 }
  0xab   : > { %v486_v22 = vmul.f32 %v700_v20, %v479_v16 }
  0xad   : > { %v500_v26 = vadd.f32 %v493_v17, %v486_v22 }
  0xae   : > { %v484_v19 = vpop.permute.xlu0 %483  ;;  %v498_v21 = vpop.permute.xlu1 %497 }
  0xaf   : > { %v487_v27 = vmul.f32 %v701_v23, %v484_v19 }
  0xb1   : > { %v501_v34 = vadd.f32 %v498_v21, %v487_v27 }
  0xb2   : > { %v507_v24 = vpop.permute.xlu0 %506  ;;  %v512_v29 = vpop.permute.xlu1 %511 }
  0xb6   : > { %v523_v32 = vpop.permute.xlu0 %522  ;;  %v528_v40 = vpop.permute.xlu1 %527 }
  0xf4   : > { %v463_v25 = vpop.f32.mrf.mxu0 }
  0xf5   : > { %v514_v28 = vmul.f32 %v507_v24, %v463_v25 }
  0xf6   : > { %v708_v30 = vpop.f32.mrf.mxu0 }
  0xf7   : > { %v516_v31 = vadd.f32 %v514_v28, %v500_v26 }
  0xf8   : > { %v466_v33 = vpop.f32.mrf.mxu0 }
  0xf9   : > { %v530_v35 = vadd.f32 %v523_v32, %v516_v31  ;;  %v515_v36 = vmul.f32 %v512_v29, %v466_v33 }
  0xfa   : > { %v709_v37 = vpop.f32.mrf.mxu0 }
  0xfb   : > { %v532_v38 = vmax.f32 %v530_v35, 0.0  ;;  %v517_v39 = vadd.f32 %v515_v36, %v501_v34 }
  0xfd   : > { %534 = vst [vmem:[%s408_s9] sm:$0xff] %v532_v38  ;;  %v531_v41 = vadd.f32 %v528_v40, %v517_v39  ;;  %542 = sbr.rel (!%p924_p6) target bundleno = 266 (0x10a), region = 134 }
  0xff   : > { %v533_v42 = vmax.f32 %v531_v41, 0.0 }
 0x101   : > { %535 = vst [vmem:[%s408_s9 + $0x8] sm:$0xff] %v533_v42 }
 0x104   : > { %v577_v43 = vld [vmem:[%s408_s9] sm:$0xff] }
 0x105   : > { %578 = vst [vmem:[%s546_s14] sm:$0xff] %v577_v43 }
 0x108   : > { %v579_v44 = vld [vmem:[%s408_s9 + $0x8] sm:$0xff] }
 0x109   : > { %580 = vst [vmem:[%s546_s14 + $0x10] sm:$0xff] %v579_v44 }
 0x10a PF: > { %s17_s30 = sadd.s32 1, %s827_s30   ;;  %s1029_s13 = sld [smem:[#allocation5_spill]] }
 0x10b   : > { %p14_p12 = scmp.ge.s32.totalorder %s17_s30, 6   ;;  %s1030_s24 = smov %s807_s25 }
 0x10c   : > { %s1031_s25 = smov %s932_s17  ;;  %s1032_s26 = smov %s819_s28 }
 0x10d   : > { %s1033_s27 = smov %s823_s29  ;;  %s1034_s28 = smov %s1037_s8 }
 0x10e   :  { %16 = sbr.rel (!%p14_p12) target bundleno = 4 (0x4), region = 211 }
 0x110   : > { %s1035_s29 = smov %s1029_s13 }

// kernel: residual_forward.3
= control target key start
LH: loop header
LB: loop body
LE: loop exit
PB: predicated region body
PF: predicated region fallthrough
CT: control target
= control target key end

     0   :  { %s1363_s15 = smov 0   ;;  %s1478_s0 = inlined_call_operand.vmem [shape: bf16[2,16,256], index: 0, kind: input, shape index: {}]   ;;  %s1479_s1 = inlined_call_operand.vmem [shape: bf16[16,144], index: 1, kind: input, shape index: {}]   ;;  %s1480_s2 = inlined_call_operand.vmem [shape: bf16[16,16], index: 2, kind: input, shape index: {}]   ;;  %s1481_s3 = inlined_call_operand.vmem [shape: bf16[2,16,256], index: 3, kind: output, shape index: {0}]   ;;  %s1482_s4 = inlined_call_operand.vmem [shape: f32[2,16,4], index: 4, kind: output, shape index: {1}]  }
   0x1 LB: > { %s1063_s16 = sadd.s32 4294967295, %s1325_s15   ;;  %p1067_p0 = scmp.ge.s32.totalorder %s1325_s15, 1  ;;  %s1325_s15 = sphi %s1363_s15, %s15_s15  }
   0x2   : > { %p165_p1 = scmp.lt.s32.totalorder %s1325_s15, 3 }
   0x4   : > { %p166_p2 = pnand %p1067_p0, %p165_p1 }
   0x5   : > { %p196_p3 = scmp.lt.s32.totalorder (!%p166_p2), %s1063_s16, 1  ;;  %s1328_s17 = smov (!%p166_p2), 112  }
   0x6   : > { %169 = sbr.rel (%p166_p2) target bundleno = 531 (0x213), region = 32  ;;  %s1330_s22 = smov (!%p166_p2), 113  }
   0x7   : > { %s1331_s23 = smov (!%p166_p2), 127   ;;  %s1332_s24 = smov (!%p166_p2), 1  }
   0x8   : > { %s1333_s25 = smov (!%p166_p2), 15   ;;  %s1334_s28 = smov (!%p166_p2), 16  }
   0x9   : > { %s1336_s29 = smov (!%p166_p2), 17   ;;  %s1337_s6 = smov (!%p166_p2), 111  }
   0xb   : > { %v1327_v0 = vmov 0.0|0.0   ;;  %s1492_s16 = smov (!%p196_p3, %s1063_s16), 1  ;;  %v1329_v7 = vmov 0.0   ;;  %v1315_v16 = vld [vmem:[%s1480_s2] sm:$0xff]   ;;  %v1335_v19 = vmov 0   ;;  %vm352_vm0 = vcmask 130048  }
   0xc   : > { %622 = vrot.lane.b32.xlu1 %v1327_v0, %s1328_s17  ;;  %618 = vrot.lane.b32.xlu0 %v1327_v0, %s1328_s17  ;;  %s1371_s18 = sshll.u32 %s1492_s16, 4  ;;  %v1318_v21 = vld [vmem:[%s1479_s1 + $0x4] ss:$8 sps:$4 sm:$0xff]   ;;  %v226_v22 = vlaneseq  ;;  %vm350_vm1 = vcmask 1043456   ;;  %vm629_vm2 = vcmask 916480   ;;  %vm567_vm3 = vcmask 924672  }
   0xd   : > { %s200_s21 = scalar_lea.vmem %s1478_s0, %s1371_s18  ;;  %906 = vmatprep.mubr.bf16.mxu1 %v1335_v19  ;;  %1116 = vmatprep.mubr.msk.bf16.mxu0 %vm352_vm0, %v1318_v21  ;;  %vm516_vm8 = vcmask 1039360   ;;  %vm447_vm12 = vcmask 7168   ;;  %vm396_vm14 = vcmask 121856   ;;  %vm289_vm15 = vcmask 138240   ;;  %v1316_v51 = vld [vmem:[%s1479_s1] ss:$8 sps:$4 sm:$0xff]   ;;  %s205_s11 = scalar_lea.vmem %s1481_s3, %s1371_s18 }
   0xe   : > { %v213_v1 = vld [vmem:[%s200_s21 + $0x8] sm:$0xff]  ;;  %v212_v2 = vld [vmem:[%s200_s21] sm:$0xff]  ;;  %v1391_v23 = vand.u32 127, %v226_v22  ;;  %s210_s14 = scalar_lea.vmem %s1482_s4, %s1371_s18 }
   0xf   : > { %v220_v3 = vunpack.c.l.bf16 %v213_v1  ;;  %v221_v4 = vunpack.c.h.bf16 %v213_v1  ;;  %v218_v5 = vunpack.c.l.bf16 %v212_v2  ;;  %v219_v6 = vunpack.c.h.bf16 %v212_v2 }
  0x10   : > { %620 = vrot.lane.b32.xlu1 %v213_v1, %s1328_s17  ;;  %616 = vrot.lane.b32.xlu0 %v212_v2, %s1328_s17  ;;  %v1377_v11 = vcombine.high %v212_v2, %v213_v1  ;;  %v1379_v12 = vcombine.low %v212_v2, %v213_v1  ;;  %v1152_v17 = vcombine.high %v212_v2, %v212_v2  ;;  %v228_v24 = vadd.s32 128, %v1391_v23 }
  0x11   : > { %v1226_v8 = vpack.i.bf16 %v1329_v7, %v221_v4  ;;  %v1221_v9 = vpack.i.bf16 %v1329_v7, %v219_v6  ;;  %v1231_v10 = vpack.i.bf16 %v220_v3, %v218_v5  ;;  %v1256_v13 = vpack.i.bf16 %v221_v4, %v220_v3 }
  0x12   : > { %888 = vmatprep.subr.bf16.mxu1 %v1377_v11  ;;  %v1251_v14 = vpack.i.bf16 %v219_v6, %v218_v5  ;;  %v1130_v15 = vpack.c.bf16 %v218_v5, %v1329_v7  ;;  %v1132_v18 = vpack.c.bf16 %v220_v3, %v1329_v7  ;;  %v1153_v20 = vcombine.high %v213_v1, %v213_v1 }
  0x13   : > { %889 = vmatpush1.bf16.msra.mxu1 %v1379_v12  ;;  %v240_v27 = vand.u32 15, %v228_v24  ;;  %v233_v31 = vand.u32 15, %v1391_v23 }
  0x14   : > { %1227 = vrot.lane.b32.xlu1 %v1226_v8, %s1330_s22  ;;  %1222 = vrot.lane.b32.xlu0 %v1221_v9, %s1330_s22 }
  0x15   : > { %v260_v30 = vadd.s32 4294967295, %v240_v27  ;;  %v259_v42 = vadd.s32 4294967295, %v233_v31  ;;  %v367_v55 = vadd.s32 1, %v240_v27  ;;  %v366_v56 = vadd.s32 1, %v233_v31 }
  0x16   : > { %1120 = vmatmul.mubr.msk.bf16.vlgmr.msra.gmra.mxu1 %vm352_vm0, %v1315_v16 }
  0x17   : > { %vm262_vm4 = vcmp.ge.s32.totalorder %v260_v30, 0  ;;  %vm261_vm6 = vcmp.ge.s32.totalorder %v259_v42, 0  ;;  %vm371_vm9 = vcmp.lt.s32.totalorder %v367_v55, 16  ;;  %vm370_vm10 = vcmp.lt.s32.totalorder %v366_v56, 16 }
  0x18   : > { %1237 = vrot.lane.b32.xlu1 %v1221_v9, %s1331_s23  ;;  %1232 = vrot.lane.b32.xlu0 %v1231_v10, %s1330_s22  ;;  %vm1399_vm5 = vmpackc.low %vm262_vm4, %vm262_vm4  ;;  %vm972_vm4 = vcmask 31744  }
  0x19   : > { %vm1407_vm7 = vmpackc.low %vm261_vm6, %vm261_vm6 }
  0x1a   : > { %vm1413_vm11 = vmpackc.low %vm371_vm9, %vm371_vm9 }
  0x1b   : > { %vm1419_vm13 = vmpackc.low %vm370_vm10, %vm370_vm10 }
  0x1c   : > { %1247 = vrot.lane.b32.xlu1 %v1231_v10, %s1331_s23  ;;  %1242 = vrot.lane.b32.xlu0 %v1226_v8, %s1331_s23 }
  0x20   : > { %1257 = vrot.lane.b32.xlu1 %v1256_v13, %s1332_s24  ;;  %1252 = vrot.lane.b32.xlu0 %v1251_v14, %s1332_s24 }
  0x24   : > { %1267 = vrot.lane.b32.xlu1 %v1251_v14, %s1333_s25  ;;  %1262 = vrot.lane.b32.xlu0 %v1329_v7, %s1332_s24 }
  0x28   : > { %1272 = vrot.lane.b32.xlu0 %v1256_v13, %s1333_s25  ;;  %338 = vrot.lane.b32.xlu1 %v1130_v15, %s1334_s28 }
  0x2c   : > { %340 = vrot.lane.b32.xlu0 %v1152_v17, %s1334_s28  ;;  %342 = vrot.lane.b32.xlu1 %v1132_v18, %s1334_s28 }
  0x30   : > { %344 = vrot.lane.b32.xlu0 %v1153_v20, %s1334_s28  ;;  %1277 = vrot.lane.b32.xlu1 %v1329_v7, %s1333_s25 }
  0x34   : > { %1282 = vrot.lane.b32.xlu0 %v1251_v14, %s1336_s29  ;;  %1287 = vrot.lane.b32.xlu1 %v1256_v13, %s1336_s29 }
  0x38   : > { %1292 = vrot.lane.b32.xlu0 %v1329_v7, %s1336_s29  ;;  %1297 = vrot.lane.b32.xlu1 %v1221_v9, %s1337_s6 }
  0x3c   : > { %1302 = vrot.lane.b32.xlu0 %v1226_v8, %s1337_s6  ;;  %1307 = vrot.lane.b32.xlu1 %v1231_v10, %s1337_s6 }
  0x7e   : > { %v623_v25 = vpop.permute.xlu1 %622  ;;  %v619_v26 = vpop.permute.xlu0 %618 }
  0x7f   : > { %v627_v32 = vrot.slane %v623_v25, 4  ;;  %v625_v33 = vrot.slane %v619_v26, 4 }
  0x82   : > { %v621_v28 = vpop.permute.xlu1 %620  ;;  %v617_v29 = vpop.permute.xlu0 %616 }
  0x83   : > { %v626_v34 = vrot.slane %v621_v28, 4  ;;  %v624_v35 = vrot.slane %v617_v29, 4 }
  0x85   : > { %v628_v36 = vsel %vm350_vm1, %v624_v35, %v625_v33  ;;  %v631_v37 = vsel %vm350_vm1, %v626_v34, %v627_v32 }
  0x86   : > { %v1228_v38 = vpop.permute.xlu1 %1227  ;;  %v1223_v39 = vpop.permute.xlu0 %1222  ;;  %v630_v40 = vsel %vm629_vm2, %v617_v29, %v628_v36  ;;  %v632_v41 = vsel %vm629_vm2, %v621_v28, %v631_v37  ;;  %vm966_vm2 = vcmp.eq.s32.totalorder %v1391_v23, 1 }
  0x87   : > { %v1230_v43 = vunpack.i.h.bf16 %v1228_v38  ;;  %v1229_v44 = vunpack.i.l.bf16 %v1228_v38  ;;  %v1225_v45 = vunpack.i.h.bf16 %v1223_v39  ;;  %v1224_v46 = vunpack.i.l.bf16 %v1223_v39 }
  0x88   : > { %v1113_v47 = vcombine.high %v630_v40, %v632_v41  ;;  %v1112_v48 = vcombine.low %v630_v40, %v632_v41 }
  0x89   : > { %v571_v49 = vsel %vm567_vm3, %v1229_v44, %v1230_v43  ;;  %v569_v50 = vsel %vm567_vm3, %v1224_v46, %v1225_v45 }
  0x8a   : > { %v1167_v52 = vpack.c.bf16 %v571_v49, %v569_v50  ;;  %811 = vmatprep.subr.bf16.mxu0 %v1113_v47  ;;  %v1238_v53 = vpop.permute.xlu1 %1237  ;;  %v1233_v54 = vpop.permute.xlu0 %1232 }
  0x8b   : > { %812 = vmatpush1.bf16.msra.mxu0 %v1112_v48  ;;  %v1235_v57 = vunpack.i.h.bf16 %v1233_v54  ;;  %v1234_v58 = vunpack.i.l.bf16 %v1233_v54  ;;  %v1240_v59 = vunpack.i.h.bf16 %v1238_v53  ;;  %v1239_v60 = vunpack.i.l.bf16 %v1238_v53 }
  0x8c   : > { %1168 = vmatprep.subr.msk.bf16.mxu0 %vm1399_vm5, %v1167_v52 }
  0x8d   : > { %v570_v61 = vsel %vm567_vm3, %v1235_v57, %v1229_v44  ;;  %v568_v62 = vsel %vm567_vm3, %v1234_v58, %v1224_v46  ;;  %v518_v7 = vsel %vm516_vm8, %v1239_v60, %v1240_v59  ;;  %vm969_vm3 = vcmp.eq.s32.totalorder %v1391_v23, 0 }
  0x8e   : > { %v1170_v0 = vpack.c.bf16 %v570_v61, %v568_v62  ;;  %v1248_v1 = vpop.permute.xlu1 %1247  ;;  %v1243_v2 = vpop.permute.xlu0 %1242 }
  0x8f   : > { %v1250_v3 = vunpack.i.h.bf16 %v1248_v1  ;;  %v1249_v4 = vunpack.i.l.bf16 %v1248_v1  ;;  %v1245_v5 = vunpack.i.h.bf16 %v1243_v2  ;;  %v1244_v6 = vunpack.i.l.bf16 %v1243_v2 }
  0x90   : > { %1171 = vmatpush1.bf16.msk.msra.mxu0 %vm1407_vm7, %v1170_v0 }
  0x91   : > { %v517_v8 = vsel %vm516_vm8, %v1249_v4, %v1239_v60  ;;  %v519_v9 = vsel %vm516_vm8, %v1250_v3, %v1244_v6  ;;  %v520_v10 = vsel %vm516_vm8, %v1244_v6, %v1245_v5 }
  0x92   : > { %v1173_v14 = vpack.c.bf16 %v520_v10, %v518_v7  ;;  %v1176_v15 = vpack.c.bf16 %v519_v9, %v517_v8  ;;  %v1258_v16 = vpop.permute.xlu1 %1257  ;;  %v1253_v17 = vpop.permute.xlu0 %1252 }
  0x93   : > { %v1260_v19 = vunpack.i.h.bf16 %v1258_v16  ;;  %v1259_v20 = vunpack.i.l.bf16 %v1258_v16  ;;  %v1255_v21 = vunpack.i.h.bf16 %v1253_v17  ;;  %v1254_v22 = vunpack.i.l.bf16 %v1253_v17 }
  0x94   : > { %1174 = vmatprep.subr.msk.bf16.mxu0 %vm1413_vm11, %v1173_v14 }
  0x95   : > { %v451_v24 = vsel %vm447_vm12, %v1259_v20, %v1260_v19  ;;  %v449_v25 = vsel %vm447_vm12, %v1254_v22, %v1255_v21  ;;  %1177 = vmatpush1.bf16.msk.msra.mxu0 %vm1419_vm13, %v1176_v15 }
  0x96   : > { %v1268_v26 = vpop.permute.xlu1 %1267  ;;  %v1263_v27 = vpop.permute.xlu0 %1262  ;;  %817 = vmatprep.subr.bf16.mxu0 %v1377_v11  ;;  %v1179_v30 = vpack.c.bf16 %v451_v24, %v449_v25 }
  0x97   : > { %v1265_v28 = vunpack.i.h.bf16 %v1263_v27  ;;  %v1264_v29 = vunpack.i.l.bf16 %v1263_v27  ;;  %v1270_v31 = vunpack.i.h.bf16 %v1268_v26  ;;  %v1269_v32 = vunpack.i.l.bf16 %v1268_v26 }
  0x99   : > { %v450_v33 = vsel %vm447_vm12, %v1265_v28, %v1259_v20  ;;  %v448_v34 = vsel %vm447_vm12, %v1264_v29, %v1254_v22  ;;  %818 = vmatpush1.bf16.msra.mxu0 %v1379_v12  ;;  %v398_v39 = vsel %vm396_vm14, %v1269_v32, %v1270_v31 }
  0x9a   : > { %v1182_v35 = vpack.c.bf16 %v450_v33, %v448_v34  ;;  %v1273_v36 = vpop.permute.xlu0 %1272  ;;  %1180 = vmatprep.subr.msk.bf16.mxu0 %vm1399_vm5, %v1179_v30  ;;  %v339_v37 = vpop.permute.xlu1 %338 }
  0x9b   : > { %v1275_v38 = vunpack.i.h.bf16 %v1273_v36  ;;  %v1274_v11 = vunpack.i.l.bf16 %v1273_v36  ;;  %v346_v44 = vrot.slane %v339_v37, 4 }
  0x9d   : > { %v400_v40 = vsel %vm396_vm14, %v1274_v11, %v1275_v38  ;;  %1183 = vmatpush1.bf16.msk.msra.mxu0 %vm1407_vm7, %v1182_v35 }
  0x9e   : > { %v1185_v41 = vpack.c.bf16 %v400_v40, %v398_v39  ;;  %v341_v42 = vpop.permute.xlu0 %340  ;;  %v343_v43 = vpop.permute.xlu1 %342 }
  0x9f   : > { %v347_v12 = vrot.slane %v341_v42, 4  ;;  %v348_v45 = vrot.slane %v343_v43, 4 }
  0xa0   : > { %1186 = vmatprep.subr.msk.bf16.mxu0 %vm1413_vm11, %v1185_v41 }
  0xa1   : > { %v351_v48 = vsel %vm350_vm1, %v346_v44, %v347_v12 }
  0xa2   : > { %v345_v46 = vpop.permute.xlu0 %344  ;;  %v1278_v47 = vpop.permute.xlu1 %1277  ;;  %v353_v59 = vsel %vm352_vm0, %v339_v37, %v351_v48 }
  0xa3   : > { %v349_v49 = vrot.slane %v345_v46, 4  ;;  %v1280_v50 = vunpack.i.h.bf16 %v1278_v47  ;;  %v1279_v52 = vunpack.i.l.bf16 %v1278_v47 }
  0xa5   : > { %v354_v53 = vsel %vm350_vm1, %v348_v45, %v349_v49  ;;  %v399_v54 = vsel %vm396_vm14, %v1280_v50, %v1274_v11  ;;  %v397_v55 = vsel %vm396_vm14, %v1279_v52, %v1269_v32  ;;  %vm963_vm1 = vcmp.eq.s32.totalorder %v1391_v23, 2 }
  0xa6   : > { %v1188_v56 = vpack.c.bf16 %v399_v54, %v397_v55  ;;  %v1283_v57 = vpop.permute.xlu0 %1282  ;;  %v1288_v58 = vpop.permute.xlu1 %1287  ;;  %v355_v60 = vsel %vm352_vm0, %v343_v43, %v354_v53  ;;  %vm661_vm0 = vcmask 908288  }
  0xa7   : > { %v1285_v61 = vunpack.i.h.bf16 %v1283_v57  ;;  %v1284_v62 = vunpack.i.l.bf16 %v1283_v57  ;;  %v1290_v0 = vunpack.i.h.bf16 %v1288_v58  ;;  %v1289_v1 = vunpack.i.l.bf16 %v1288_v58 }
  0xa8   : > { %1189 = vmatpush1.bf16.msk.msra.mxu0 %vm1419_vm13, %v1188_v56  ;;  %v1101_v2 = vcombine.high %v353_v59, %v355_v60  ;;  %v1100_v8 = vcombine.low %v353_v59, %v355_v60 }
  0xa9   : > { %v291_v3 = vsel %vm289_vm15, %v1284_v62, %v1285_v61  ;;  %v293_v4 = vsel %vm289_vm15, %v1289_v1, %v1290_v0 }
  0xaa   : > { %v1191_v5 = vpack.c.bf16 %v293_v4, %v291_v3  ;;  %823 = vmatprep.subr.bf16.mxu0 %v1101_v2  ;;  %v1293_v6 = vpop.permute.xlu0 %1292  ;;  %v1298_v7 = vpop.permute.xlu1 %1297 }
  0xab   : > { %v1295_v9 = vunpack.i.h.bf16 %v1293_v6  ;;  %v1294_v10 = vunpack.i.l.bf16 %v1293_v6  ;;  %v1300_v16 = vunpack.i.h.bf16 %v1298_v7  ;;  %v1299_v17 = vunpack.i.l.bf16 %v1298_v7 }
  0xac   : > { %824 = vmatpush1.bf16.msra.mxu0 %v1100_v8 }
  0xad   : > { %v290_v14 = vsel %vm289_vm15, %v1294_v10, %v1284_v62  ;;  %v292_v15 = vsel %vm289_vm15, %v1295_v9, %v1289_v1  ;;  %1192 = vmatprep.subr.msk.bf16.mxu0 %vm1399_vm5, %v1191_v5  ;;  %v663_v27 = vsel %vm661_vm0, %v1299_v17, %v1300_v16 }
  0xae   : > { %v1194_v19 = vpack.c.bf16 %v292_v15, %v290_v14  ;;  %v1303_v20 = vpop.permute.xlu0 %1302  ;;  %v1308_v21 = vpop.permute.xlu1 %1307 }
  0xaf   : > { %v1305_v22 = vunpack.i.h.bf16 %v1303_v20  ;;  %v1304_v24 = vunpack.i.l.bf16 %v1303_v20  ;;  %v1310_v25 = vunpack.i.h.bf16 %v1308_v21  ;;  %v1309_v26 = vunpack.i.l.bf16 %v1308_v21 }
  0xb0   : > { %1195 = vmatpush1.bf16.msk.msra.mxu0 %vm1407_vm7, %v1194_v19 }
  0xb1   : > { %v665_v28 = vsel %vm661_vm0, %v1304_v24, %v1305_v22  ;;  %v664_v29 = vsel %vm661_vm0, %v1310_v25, %v1304_v24  ;;  %v662_v30 = vsel %vm661_vm0, %v1309_v26, %v1299_v17 }
  0xb2   : > { %v1197_v31 = vpack.c.bf16 %v665_v28, %v663_v27  ;;  %v1200_v32 = vpack.c.bf16 %v664_v29, %v662_v30 }
  0xb4   : > { %1198 = vmatprep.subr.msk.bf16.mxu0 %vm1413_vm11, %v1197_v31 }
  0xb5   : > { %1201 = vmatpush2.bf16.msk.msra.mxu0 %vm1419_vm13, %v1200_v32 }
  0xb8   : > { %844 = vmatmul.mubr.bf16.vlgmr.msra.gmra.mxu0 %v1316_v51 }
  0xd6   : > { %v908_v33 = vpop.f32.mrf.mxu1 }
  0xd7   : > { %v953_v63 = vmul.f32 %v908_v33, %v908_v33 }
  0xd8   : > { %v910_v34 = vpop.f32.mrf.mxu1 }
  0xd9   : > { %v954_v35 = vmul.f32 %v910_v34, %v910_v34  ;;  %v947_v36 = vadd.f32 %v910_v34, %v908_v33 }
  0xda   : > { %v912_v37 = vpop.f32.mrf.mxu1 }
  0xdb   : > { %948 = vadd.xlane.f32.xlu0 %v947_v36  ;;  %v955_v38 = vmul.f32 %v912_v37, %v912_v37  ;;  %v957_v11 = vadd.f32 %v954_v35, %v953_v63 }
  0xdc   : > { %v914_v13 = vpop.f32.mrf.mxu1 }
  0xdd   : > { %v950_v39 = vadd.f32 %v914_v13, %v912_v37  ;;  %v956_v40 = vmul.f32 %v914_v13, %v914_v13 }
  0xdf   : > { %958 = vadd.xlane.f32.xlu0 %v957_v11  ;;  %v960_v41 = vadd.f32 %v956_v40, %v955_v38  ;;  %951 = vadd.xlane.f32.xlu1 %v950_v39 }
  0xe3   : > { %961 = vadd.xlane.f32.xlu0 %v960_v41 }
 0x164   : > { %v949_v55 = vpop.xlane.xlu0 %948 }
 0x168   : > { %v959_v56 = vpop.xlane.xlu0 %958  ;;  %v952_v57 = vpop.xlane.xlu1 %951 }
 0x169   : > { %v964_v60 = vsel %vm963_vm1, %v949_v55, %v959_v56 }
 0x16c   : > { %v962_v58 = vpop.xlane.xlu0 %961 }
 0x16d   : > { %v965_v2 = vsel %vm963_vm1, %v952_v57, %v962_v58 }
 0x178   : > { %v845_v18 = vpop.f32.mrf.mxu0 }
 0x179   : > { %v937_v12 = vmul.f32 %v845_v18, %v845_v18 }
 0x17a   : > { %v847_v42 = vpop.f32.mrf.mxu0 }
 0x17b   : > { %v1150_v43 = vpack.c.bf16 %v847_v42, %v845_v18  ;;  %v938_v44 = vmul.f32 %v847_v42, %v847_v42  ;;  %v931_v52 = vadd.f32 %v847_v42, %v845_v18 }
 0x17c   : > { %v849_v45 = vpop.f32.mrf.mxu0 }
 0x17d   : > { %929 = vst [vmem:[%s205_s11] sm:$0xff] %v1150_v43  ;;  %v941_v46 = vadd.f32 %v938_v44, %v937_v12  ;;  %v939_v50 = vmul.f32 %v849_v45, %v849_v45 }
 0x17e   : > { %v851_v47 = vpop.f32.mrf.mxu0 }
 0x17f   : > { %v1151_v48 = vpack.c.bf16 %v851_v47, %v849_v45  ;;  %v940_v49 = vmul.f32 %v851_v47, %v851_v47  ;;  %942 = vadd.xlane.f32.xlu1 %v941_v46  ;;  %v934_v54 = vadd.f32 %v851_v47, %v849_v45 }
 0x181   : > { %930 = vst [vmem:[%s205_s11 + $0x8] sm:$0xff] %v1151_v48  ;;  %v944_v53 = vadd.f32 %v940_v49, %v939_v50 }
 0x183   : > { %932 = vadd.xlane.f32.xlu1 %v931_v52  ;;  %945 = vadd.xlane.f32.xlu0 %v944_v53 }
 0x187   : > { %935 = vadd.xlane.f32.xlu0 %v934_v54 }
 0x208   : > { %v943_v59 = vpop.xlane.xlu1 %942 }
 0x209   : > { %v967_v61 = vsel %vm966_vm2, %v943_v59, %v964_v60 }
 0x20c   : > { %v933_v62 = vpop.xlane.xlu1 %932  ;;  %v946_v0 = vpop.xlane.xlu0 %945 }
 0x20d   : > { %v970_v1 = vsel %vm969_vm3, %v933_v62, %v967_v61  ;;  %v968_v3 = vsel %vm966_vm2, %v946_v0, %v965_v2 }
 0x20e   : > { %973 = vst.msk [vmem:[%s210_s14] sm:$0xff] %vm972_vm4, %v970_v1 }
 0x210   : > { %v936_v4 = vpop.xlane.xlu0 %935 }
 0x211   : > { %v971_v5 = vsel %vm969_vm3, %v936_v4, %v968_v3 }
 0x212   : > { %974 = vst.msk [vmem:[%s210_s14 + $0x8] sm:$0xff] %vm972_vm4, %v971_v5 }
 0x213 PF: > { %s15_s15 = sadd.s32 1, %s1325_s15  }
 0x214   : > { %p12_p4 = scmp.ge.s32.totalorder %s15_s15, 4  }
 0x216   :  { %14 = sbr.rel (!%p12_p4) target bundleno = 1 (0x1), region = 74 }

// kernel: residual_forward.4
= control target key start
LH: loop header
LB: loop body
LE: loop exit
PB: predicated region body
PF: predicated region fallthrough
CT: control target
= control target key end

     0   :  { %s1339_s18 = smov 0   ;;  %s1508_s0 = inlined_call_operand.vmem [shape: bf16[2,16,256], index: 0, kind: input, shape index: {}]   ;;  %s1509_s1 = inlined_call_operand.vmem [shape: bf16[16,144], index: 1, kind: input, shape index: {}]   ;;  %s1510_s2 = inlined_call_operand.vmem [shape: f32[16,1], index: 2, kind: input, shape index: {}]   ;;  %s1511_s3 = inlined_call_operand.vmem [shape: f32[16,1], index: 3, kind: input, shape index: {}]   ;;  %s1512_s4 = inlined_call_operand.vmem [shape: bf16[2,16,256], index: 4, kind: output, shape index: {0}]   ;;  %s1513_s5 = inlined_call_operand.vmem [shape: f32[2,16,2], index: 5, kind: output, shape index: {1}]  }
   0x1 LB: > { %s1041_s19 = sadd.s32 4294967295, %s1296_s18   ;;  %p1045_p0 = scmp.ge.s32.totalorder %s1296_s18, 1  ;;  %s1296_s18 = sphi %s1339_s18, %s16_s18  }
   0x2   : > { %p190_p1 = scmp.lt.s32.totalorder %s1296_s18, 3 }
   0x4   : > { %p191_p2 = pnand %p1045_p0, %p190_p1 }
   0x5   : > { %s1300_s28 = smov (!%p191_p2), 112   ;;  %p223_p3 = scmp.lt.s32.totalorder (!%p191_p2), %s1041_s19, 1 }
   0x6   : > { %194 = sbr.rel (%p191_p2) target bundleno = 662 (0x296), region = 36  ;;  %s1302_s8 = smov (!%p191_p2), 113  }
   0x7   : > { %s1303_s9 = smov (!%p191_p2), 127   ;;  %s1304_s10 = smov (!%p191_p2), 1  }
   0x8   : > { %s1305_s11 = smov (!%p191_p2), 15   ;;  %s1306_s12 = smov (!%p191_p2), 16  }
   0x9   : > { %s1307_s13 = smov (!%p191_p2), 17   ;;  %s1308_s14 = smov (!%p191_p2), 111  }
   0xb   : > { %v261_v0 = vld [vmem:[%s1511_s3] sm:$0xff]  ;;  %v1298_v2 = vmov 0   ;;  %v262_v3 = vld [vmem:[%s1511_s3 + $0x8] sm:$0xff]  ;;  %v1299_v5 = vmov 0.0|0.0   ;;  %s1523_s19 = smov (!%p223_p3, %s1041_s19), 1  ;;  %v1301_v25 = vmov 0.0   ;;  %v289_v44 = vlaneseq }
   0xc   : > { %v245_v1 = vld [vmem:[%s1510_s2] sm:$0xff]  ;;  %1196 = vset.pattern.permute.xlu1 %v1298_v2  ;;  %1195 = vset.pattern.permute.xlu0 %v1298_v2  ;;  %v246_v4 = vld [vmem:[%s1510_s2 + $0x8] sm:$0xff]  ;;  %s1361_s29 = sshll.u32 %s1523_s19, 4  ;;  %vm415_vm0 = vcmask 130048   ;;  %vm413_vm1 = vcmask 1043456   ;;  %vm630_vm2 = vcmask 924672  }
   0xd   : > { %265 = vperm.xlu1 %1196, %v261_v0   ;;  %249 = vperm.xlu0 %1195, %v245_v1   ;;  %s227_s7 = scalar_lea.vmem %s1508_s0, %s1361_s29  ;;  %v1289_v42 = vld [vmem:[%s1509_s1 + $0x4] ss:$8 sps:$4 sm:$0xff]   ;;  %v1403_v47 = vand.u32 127, %v289_v44  ;;  %vm692_vm3 = vcmask 916480   ;;  %vm579_vm5 = vcmask 1039360   ;;  %vm510_vm13 = vcmask 7168   ;;  %s232_s22 = scalar_lea.vmem %s1512_s4, %s1361_s29 }
   0xe   : > { %v239_v6 = vld [vmem:[%s227_s7] sm:$0xff]  ;;  %v240_v9 = vld [vmem:[%s227_s7 + $0x8] sm:$0xff]  ;;  %1094 = vmatprep.mubr.msk.bf16.mxu0 %vm415_vm0, %v1289_v42  ;;  %vm459_vm14 = vcmask 121856   ;;  %vm352_vm15 = vcmask 138240   ;;  %s237_s25 = scalar_lea.vmem %s1513_s5, %s1361_s29 }
   0xf   : > { %v241_v7 = vunpack.c.l.bf16 %v239_v6  ;;  %v242_v8 = vunpack.c.h.bf16 %v239_v6  ;;  %v243_v14 = vunpack.c.l.bf16 %v240_v9  ;;  %v244_v15 = vunpack.c.h.bf16 %v240_v9 }
  0x10   : > { %v291_v50 = vadd.s32 128, %v1403_v47  ;;  %v296_v55 = vand.u32 15, %v1403_v47 }
  0x11   : > { %270 = vperm.xlu1 %1196, %v262_v3   ;;  %254 = vperm.xlu0 %1195, %v246_v4  }
  0x12   : > { %v303_v53 = vand.u32 15, %v291_v50  ;;  %v322_v1 = vadd.s32 4294967295, %v296_v55 }
  0x14   : > { %v323_v59 = vadd.s32 4294967295, %v303_v53  ;;  %vm324_vm6 = vcmp.ge.s32.totalorder %v322_v1, 0 }
  0x15   : > { %681 = vrot.lane.b32.xlu1 %v1299_v5, %s1300_s28  ;;  %vm1430_vm9 = vmpackc.low %vm324_vm6, %vm324_vm6 }
  0x16   : > { %vm325_vm4 = vcmp.ge.s32.totalorder %v323_v59, 0 }
  0x17   : > { %vm1417_vm7 = vmpackc.low %vm325_vm4, %vm325_vm4 }
  0x19   : > { %685 = vrot.lane.b32.xlu1 %v1299_v5, %s1300_s28  ;;  %v430_v5 = vadd.s32 1, %v303_v53 }
  0x1b   : > { %vm434_vm8 = vcmp.lt.s32.totalorder %v430_v5, 16 }
  0x1c   : > { %vm1435_vm10 = vmpackc.low %vm434_vm8, %vm434_vm8 }
  0x88   : > { %v266_v10 = vpop.permute.xlu1 %265  ;;  %v250_v11 = vpop.permute.xlu0 %249 }
  0x89   : > { %v257_v12 = vmul.f32 %v250_v11, %v241_v7  ;;  %v258_v13 = vmul.f32 %v250_v11, %v242_v8 }
  0x8b   : > { %v274_v16 = vadd.f32 %v266_v10, %v258_v13  ;;  %v273_v18 = vadd.f32 %v266_v10, %v257_v12 }
  0x8c   : > { %v255_v17 = vpop.permute.xlu0 %254  ;;  %v271_v22 = vpop.permute.xlu1 %270 }
  0x8d   : > { %v1367_v19 = vmax.f32 %v274_v16, 0.0  ;;  %v259_v20 = vmul.f32 %v255_v17, %v243_v14  ;;  %v260_v21 = vmul.f32 %v255_v17, %v244_v15  ;;  %v1370_v27 = vmax.f32 %v273_v18, 0.0 }
  0x8f   : > { %v275_v23 = vadd.f32 %v271_v22, %v259_v20  ;;  %v276_v24 = vadd.f32 %v271_v22, %v260_v21  ;;  %v1197_v26 = vpack.i.bf16 %v1301_v25, %v1367_v19  ;;  %v1112_v33 = vpack.c.bf16 %v1367_v19, %v1370_v27 }
  0x90   : > { %v1242_v37 = vpack.i.bf16 %v1367_v19, %v1370_v27  ;;  %v1104_v38 = vpack.c.bf16 %v1370_v27, %v1301_v25  ;;  %v1105_v39 = vpack.c.bf16 %v1367_v19, %v1367_v19  ;;  %v682_v43 = vpop.permute.xlu1 %681  ;;  %v429_v22 = vadd.s32 1, %v296_v55 }
  0x91   : > { %v1372_v28 = vmax.f32 %v275_v23, 0.0  ;;  %v1374_v29 = vmax.f32 %v276_v24, 0.0  ;;  %1198 = vrot.lane.b32.xlu0 %v1197_v26, %s1302_s8  ;;  %v688_v56 = vrot.slane %v682_v43, 4 }
  0x92   : > { %vm433_vm11 = vcmp.lt.s32.totalorder %v429_v22, 16 }
  0x93   : > { %v1202_v30 = vpack.i.bf16 %v1301_v25, %v1374_v29  ;;  %v1207_v31 = vpack.i.bf16 %v1372_v28, %v1370_v27  ;;  %v1133_v32 = vpack.c.bf16 %v1374_v29, %v1367_v19  ;;  %v1132_v34 = vpack.c.bf16 %v1372_v28, %v1370_v27  ;;  %vm1445_vm12 = vmpackc.low %vm433_vm11, %vm433_vm11 }
  0x94   : > { %v1113_v35 = vpack.c.bf16 %v1374_v29, %v1372_v28  ;;  %v1232_v36 = vpack.i.bf16 %v1374_v29, %v1372_v28  ;;  %v1106_v40 = vpack.c.bf16 %v1372_v28, %v1301_v25  ;;  %v1107_v41 = vpack.c.bf16 %v1374_v29, %v1374_v29  ;;  %v686_v45 = vpop.permute.xlu1 %685 }
  0x95   : > { %1203 = vrot.lane.b32.xlu1 %v1202_v30, %s1302_s8  ;;  %1208 = vrot.lane.b32.xlu0 %v1207_v31, %s1302_s8  ;;  %v690_v60 = vrot.slane %v686_v45, 4 }
  0x99   : > { %1213 = vrot.lane.b32.xlu1 %v1197_v26, %s1303_s9  ;;  %679 = vrot.lane.b32.xlu0 %v1112_v33, %s1300_s28 }
  0x9d   : > { %1223 = vrot.lane.b32.xlu1 %v1207_v31, %s1303_s9  ;;  %683 = vrot.lane.b32.xlu0 %v1113_v35, %s1300_s28 }
  0xa1   : > { %1233 = vrot.lane.b32.xlu1 %v1232_v36, %s1304_s10  ;;  %1218 = vrot.lane.b32.xlu0 %v1202_v30, %s1303_s9 }
  0xa5   : > { %1243 = vrot.lane.b32.xlu1 %v1242_v37, %s1305_s11  ;;  %1228 = vrot.lane.b32.xlu0 %v1242_v37, %s1304_s10 }
  0xa9   : > { %1253 = vrot.lane.b32.xlu1 %v1301_v25, %s1305_s11  ;;  %1238 = vrot.lane.b32.xlu0 %v1301_v25, %s1304_s10 }
  0xad   : > { %1248 = vrot.lane.b32.xlu0 %v1232_v36, %s1305_s11  ;;  %401 = vrot.lane.b32.xlu1 %v1104_v38, %s1306_s12 }
  0xb1   : > { %403 = vrot.lane.b32.xlu0 %v1105_v39, %s1306_s12  ;;  %405 = vrot.lane.b32.xlu1 %v1106_v40, %s1306_s12 }
  0xb5   : > { %407 = vrot.lane.b32.xlu0 %v1107_v41, %s1306_s12  ;;  %1263 = vrot.lane.b32.xlu1 %v1232_v36, %s1307_s13 }
  0xb9   : > { %1258 = vrot.lane.b32.xlu0 %v1242_v37, %s1307_s13  ;;  %1273 = vrot.lane.b32.xlu1 %v1197_v26, %s1308_s14 }
  0xbd   : > { %1268 = vrot.lane.b32.xlu0 %v1301_v25, %s1307_s13  ;;  %1283 = vrot.lane.b32.xlu1 %v1207_v31, %s1308_s14 }
  0xc1   : > { %1278 = vrot.lane.b32.xlu0 %v1202_v30, %s1308_s14 }
 0x103   : > { %v1199_v46 = vpop.permute.xlu0 %1198 }
 0x104   : > { %v1201_v2 = vunpack.i.h.bf16 %v1199_v46  ;;  %v1200_v3 = vunpack.i.l.bf16 %v1199_v46 }
 0x106   : > { %v632_v17 = vsel %vm630_vm2, %v1200_v3, %v1201_v2 }
 0x107   : > { %v1204_v48 = vpop.permute.xlu1 %1203  ;;  %v1209_v49 = vpop.permute.xlu0 %1208 }
 0x108   : > { %v1206_v61 = vunpack.i.h.bf16 %v1204_v48  ;;  %v1205_v62 = vunpack.i.l.bf16 %v1204_v48  ;;  %v1211_v6 = vunpack.i.h.bf16 %v1209_v49  ;;  %v1210_v7 = vunpack.i.l.bf16 %v1209_v49 }
 0x10a   : > { %v634_v11 = vsel %vm630_vm2, %v1205_v62, %v1206_v61  ;;  %v633_v24 = vsel %vm630_vm2, %v1211_v6, %v1205_v62  ;;  %v631_v25 = vsel %vm630_vm2, %v1210_v7, %v1200_v3  ;;  %vm950_vm2 = vcmask 15360  }
 0x10b   : > { %v1406_v51 = vpop.permute.xlu1 %1213  ;;  %v680_v52 = vpop.permute.xlu0 %679  ;;  %v1141_v23 = vpack.c.bf16 %v634_v11, %v632_v17  ;;  %v1144_v37 = vpack.c.bf16 %v633_v24, %v631_v25 }
 0x10c   : > { %v687_v54 = vrot.slane %v680_v52, 4  ;;  %v1216_v18 = vunpack.i.h.bf16 %v1406_v51  ;;  %v1215_v20 = vunpack.i.l.bf16 %v1406_v51 }
 0x10e   : > { %v691_v0 = vsel %vm413_vm1, %v687_v54, %v688_v56  ;;  %v581_v38 = vsel %vm579_vm5, %v1215_v20, %v1216_v18 }
 0x10f   : > { %v1224_v57 = vpop.permute.xlu1 %1223  ;;  %v684_v58 = vpop.permute.xlu0 %683  ;;  %v693_v14 = vsel %vm692_vm3, %v680_v52, %v691_v0 }
 0x110   : > { %v689_v63 = vrot.slane %v684_v58, 4  ;;  %v1226_v33 = vunpack.i.h.bf16 %v1224_v57  ;;  %v1225_v35 = vunpack.i.l.bf16 %v1224_v57 }
 0x112   : > { %v694_v4 = vsel %vm413_vm1, %v689_v63, %v690_v60  ;;  %v580_v46 = vsel %vm579_vm5, %v1225_v35, %v1215_v20 }
 0x113   : > { %v1411_v8 = vpop.permute.xlu1 %1233  ;;  %v1219_v9 = vpop.permute.xlu0 %1218  ;;  %v695_v10 = vsel %vm692_vm3, %v684_v58, %v694_v4 }
 0x114   : > { %v1221_v12 = vunpack.i.h.bf16 %v1219_v9  ;;  %v1220_v13 = vunpack.i.l.bf16 %v1219_v9  ;;  %v1091_v15 = vcombine.high %v693_v14, %v695_v10  ;;  %v1090_v16 = vcombine.low %v693_v14, %v695_v10 }
 0x115   : > { %v1236_v49 = vunpack.i.h.bf16 %v1411_v8  ;;  %v1235_v50 = vunpack.i.l.bf16 %v1411_v8 }
 0x116   : > { %874 = vmatprep.subr.bf16.mxu0 %v1091_v15  ;;  %v583_v31 = vsel %vm579_vm5, %v1220_v13, %v1221_v12  ;;  %v582_v40 = vsel %vm579_vm5, %v1226_v33, %v1220_v13 }
 0x117   : > { %v1423_v26 = vpop.permute.xlu1 %1243  ;;  %v1229_v30 = vpop.permute.xlu0 %1228  ;;  %875 = vmatpush1.bf16.msra.mxu0 %v1090_v16  ;;  %v1147_v41 = vpack.c.bf16 %v583_v31, %v581_v38  ;;  %v1150_v51 = vpack.c.bf16 %v582_v40, %v580_v46  ;;  %v514_v59 = vsel %vm510_vm13, %v1235_v50, %v1236_v49 }
 0x118   : > { %1142 = vmatprep.subr.msk.bf16.mxu0 %vm1417_vm7, %v1141_v23  ;;  %v1231_v44 = vunpack.i.h.bf16 %v1229_v30  ;;  %v1230_v45 = vunpack.i.l.bf16 %v1229_v30  ;;  %v1246_v60 = vunpack.i.h.bf16 %v1423_v26  ;;  %v1245_v61 = vunpack.i.l.bf16 %v1423_v26 }
 0x11a   : > { %v512_v56 = vsel %vm510_vm13, %v1230_v45, %v1231_v44 }
 0x11b   : > { %v1254_v42 = vpop.permute.xlu1 %1253  ;;  %v1239_v43 = vpop.permute.xlu0 %1238  ;;  %1145 = vmatpush1.bf16.msk.msra.mxu0 %vm1430_vm9, %v1144_v37  ;;  %v1153_v62 = vpack.c.bf16 %v514_v59, %v512_v56 }
 0x11c   : > { %1148 = vmatprep.subr.msk.bf16.mxu0 %vm1435_vm10, %v1147_v41  ;;  %v1241_v52 = vunpack.i.h.bf16 %v1239_v43  ;;  %v1240_v53 = vunpack.i.l.bf16 %v1239_v43  ;;  %v1256_v63 = vunpack.i.h.bf16 %v1254_v42  ;;  %v1255_v19 = vunpack.i.l.bf16 %v1254_v42 }
 0x11e   : > { %v513_v0 = vsel %vm510_vm13, %v1241_v52, %v1235_v50  ;;  %v511_v1 = vsel %vm510_vm13, %v1240_v53, %v1230_v45  ;;  %v460_v27 = vsel %vm459_vm14, %v1255_v19, %v1245_v61 }
 0x11f   : > { %v1249_v54 = vpop.permute.xlu0 %1248  ;;  %v402_v55 = vpop.permute.xlu1 %401  ;;  %1151 = vmatpush1.bf16.msk.msra.mxu0 %vm1445_vm12, %v1150_v51  ;;  %v1156_v5 = vpack.c.bf16 %v513_v0, %v511_v1 }
 0x120   : > { %v1251_v57 = vunpack.i.h.bf16 %v1249_v54  ;;  %v1250_v58 = vunpack.i.l.bf16 %v1249_v54  ;;  %880 = vmatprep.subr.bf16.mxu0 %v1133_v32  ;;  %v461_v32 = vsel %vm459_vm14, %v1245_v61, %v1246_v60  ;;  %v409_v8 = vrot.slane %v402_v55, 4 }
 0x122   : > { %v463_v4 = vsel %vm459_vm14, %v1250_v58, %v1251_v57  ;;  %v462_v6 = vsel %vm459_vm14, %v1256_v63, %v1250_v58  ;;  %v1287_v57 = vld [vmem:[%s1509_s1] ss:$8 sps:$4 sm:$0xff]  }
 0x123   : > { %v404_v2 = vpop.permute.xlu0 %403  ;;  %v406_v3 = vpop.permute.xlu1 %405  ;;  %881 = vmatpush1.bf16.msra.mxu0 %v1132_v34  ;;  %v1159_v7 = vpack.c.bf16 %v463_v4, %v461_v32  ;;  %v1162_v34 = vpack.c.bf16 %v462_v6, %v460_v27 }
 0x124   : > { %v410_v29 = vrot.slane %v404_v2, 4  ;;  %1154 = vmatprep.subr.msk.bf16.mxu0 %vm1417_vm7, %v1153_v62  ;;  %v411_v11 = vrot.slane %v406_v3, 4 }
 0x126   : > { %v414_v28 = vsel %vm413_vm1, %v409_v8, %v410_v29 }
 0x127   : > { %v408_v9 = vpop.permute.xlu0 %407  ;;  %v1264_v10 = vpop.permute.xlu1 %1263  ;;  %1157 = vmatpush1.bf16.msk.msra.mxu0 %vm1430_vm9, %v1156_v5  ;;  %v416_v23 = vsel %vm415_vm0, %v402_v55, %v414_v28 }
 0x128   : > { %v412_v12 = vrot.slane %v408_v9, 4  ;;  %1160 = vmatprep.subr.msk.bf16.mxu0 %vm1435_vm10, %v1159_v7  ;;  %v1266_v14 = vunpack.i.h.bf16 %v1264_v10  ;;  %v1265_v15 = vunpack.i.l.bf16 %v1264_v10 }
 0x12a   : > { %v417_v13 = vsel %vm413_vm1, %v411_v11, %v412_v12  ;;  %v356_v26 = vsel %vm352_vm15, %v1265_v15, %v1266_v14  ;;  %vm947_vm1 = vcmp.eq.s32.totalorder %v1403_v47, 0 }
 0x12b   : > { %v1259_v16 = vpop.permute.xlu0 %1258  ;;  %v1274_v17 = vpop.permute.xlu1 %1273  ;;  %v418_v18 = vsel %vm415_vm0, %v406_v3, %v417_v13  ;;  %1163 = vmatpush1.bf16.msk.msra.mxu0 %vm1445_vm12, %v1162_v34  ;;  %vm724_vm0 = vcmask 908288  }
 0x12c   : > { %v1261_v20 = vunpack.i.h.bf16 %v1259_v16  ;;  %v1260_v22 = vunpack.i.l.bf16 %v1259_v16  ;;  %v1079_v24 = vcombine.high %v416_v23, %v418_v18  ;;  %v1078_v25 = vcombine.low %v416_v23, %v418_v18 }
 0x12d   : > { %v1276_v40 = vunpack.i.h.bf16 %v1274_v17  ;;  %v1275_v41 = vunpack.i.l.bf16 %v1274_v17 }
 0x12e   : > { %v354_v30 = vsel %vm352_vm15, %v1260_v22, %v1261_v20  ;;  %886 = vmatprep.subr.bf16.mxu0 %v1079_v24 }
 0x12f   : > { %v1165_v31 = vpack.c.bf16 %v356_v26, %v354_v30  ;;  %v1269_v33 = vpop.permute.xlu0 %1268  ;;  %v1284_v35 = vpop.permute.xlu1 %1283  ;;  %887 = vmatpush1.bf16.msra.mxu0 %v1078_v25  ;;  %v726_v52 = vsel %vm724_vm0, %v1275_v41, %v1276_v40 }
 0x130   : > { %v1271_v37 = vunpack.i.h.bf16 %v1269_v33  ;;  %v1270_v38 = vunpack.i.l.bf16 %v1269_v33  ;;  %v1285_v44 = vunpack.i.l.bf16 %v1284_v35  ;;  %v1286_v49 = vunpack.i.h.bf16 %v1284_v35 }
 0x131   : > { %1166 = vmatprep.subr.msk.bf16.mxu0 %vm1417_vm7, %v1165_v31 }
 0x132   : > { %v353_v42 = vsel %vm352_vm15, %v1270_v38, %v1260_v22  ;;  %v355_v43 = vsel %vm352_vm15, %v1271_v37, %v1265_v15  ;;  %v725_v53 = vsel %vm724_vm0, %v1285_v44, %v1275_v41 }
 0x133   : > { %v1168_v45 = vpack.c.bf16 %v355_v43, %v353_v42  ;;  %v1279_v46 = vpop.permute.xlu0 %1278 }
 0x134   : > { %v1281_v50 = vunpack.i.h.bf16 %v1279_v46  ;;  %v1280_v51 = vunpack.i.l.bf16 %v1279_v46 }
 0x135   : > { %1169 = vmatpush1.bf16.msk.msra.mxu0 %vm1430_vm9, %v1168_v45 }
 0x136   : > { %v727_v21 = vsel %vm724_vm0, %v1286_v49, %v1280_v51  ;;  %v728_v54 = vsel %vm724_vm0, %v1280_v51, %v1281_v50 }
 0x137   : > { %v1171_v55 = vpack.c.bf16 %v728_v54, %v726_v52  ;;  %v1174_v56 = vpack.c.bf16 %v727_v21, %v725_v53 }
 0x139   : > { %1172 = vmatprep.subr.msk.bf16.mxu0 %vm1435_vm10, %v1171_v55 }
 0x13a   : > { %1175 = vmatpush2.bf16.msk.msra.mxu0 %vm1445_vm12, %v1174_v56 }
 0x13d   : > { %907 = vmatmul.mubr.bf16.vlgmr.msra.gmra.mxu0 %v1287_v57 }
 0x1fd   : > { %v908_v58 = vpop.f32.mrf.mxu0 }
 0x1fe   : > { %v937_v39 = vmul.f32 %v908_v58, %v908_v58 }
 0x1ff   : > { %v910_v36 = vpop.f32.mrf.mxu0 }
 0x200   : > { %v1124_v59 = vpack.c.bf16 %v910_v36, %v908_v58  ;;  %v931_v60 = vadd.f32 %v910_v36, %v908_v58  ;;  %v938_v61 = vmul.f32 %v910_v36, %v910_v36 }
 0x201   : > { %v912_v62 = vpop.f32.mrf.mxu0 }
 0x202   : > { %932 = vadd.xlane.f32.xlu0 %v931_v60  ;;  %929 = vst [vmem:[%s232_s22] sm:$0xff] %v1124_v59  ;;  %v941_v48 = vadd.f32 %v938_v61, %v937_v39  ;;  %v939_v3 = vmul.f32 %v912_v62, %v912_v62 }
 0x203   : > { %v914_v63 = vpop.f32.mrf.mxu0 }
 0x204   : > { %v1125_v0 = vpack.c.bf16 %v914_v63, %v912_v62  ;;  %v940_v1 = vmul.f32 %v914_v63, %v914_v63  ;;  %v934_v2 = vadd.f32 %v914_v63, %v912_v62 }
 0x206   : > { %930 = vst [vmem:[%s232_s22 + $0x8] sm:$0xff] %v1125_v0  ;;  %942 = vadd.xlane.f32.xlu0 %v941_v48  ;;  %935 = vadd.xlane.f32.xlu1 %v934_v2  ;;  %v944_v4 = vadd.f32 %v940_v1, %v939_v3 }
 0x20a   : > { %945 = vadd.xlane.f32.xlu0 %v944_v4 }
 0x28b   : > { %v933_v19 = vpop.xlane.xlu0 %932 }
 0x28f   : > { %v943_v29 = vpop.xlane.xlu0 %942  ;;  %v936_v5 = vpop.xlane.xlu1 %935 }
 0x290   : > { %v948_v32 = vsel %vm947_vm1, %v933_v19, %v943_v29 }
 0x291   : > { %951 = vst.msk [vmem:[%s237_s25] sm:$0xff] %vm950_vm2, %v948_v32 }
 0x293   : > { %v946_v6 = vpop.xlane.xlu0 %945 }
 0x294   : > { %v949_v7 = vsel %vm947_vm1, %v936_v5, %v946_v6 }
 0x295   : > { %952 = vst.msk [vmem:[%s237_s25 + $0x8] sm:$0xff] %vm950_vm2, %v949_v7 }
 0x296 PF: > { %s16_s18 = sadd.s32 1, %s1296_s18  }
 0x297   : > { %p13_p4 = scmp.ge.s32.totalorder %s16_s18, 4  }
 0x299   :  { %15 = sbr.rel (!%p13_p4) target bundleno = 1 (0x1), region = 78 }

</bundles_post_ra>
